<compile_context>
chip_gen: v7x
topology: tpu7x:2x2x1
jax: 0.10.0
libtpu: 0.0.40
codegen_flags: <defaults>
</compile_context>

<pallas_src>
import functools
import math

import numpy as np
import jax
import jax.numpy as jnp
from jax.experimental import pallas as pl
from jax.experimental.pallas import tpu as pltpu


def _mpnn2_kernel(h_ref, graph_ref, wslab_ref, out_ref, *, G, N, F, R,
                  num_wkr, num_tsk):
    """Both pull phases (workers, then tasks) for a block of G dense graphs.

    wslab_ref row layout per phase (all sections 8-row aligned):
      rows [0, F)              w1[:F, :]   (source-feature part of w1)
      rows [F, 2F)             w2
      row  2F                  b2                      (then pad to 2F+8)
      row  2F+8                w3[:F, 0]^T  (message part of w3, pad to 2F+16)
      rows [2F+16, 2F+16+R)    e_r @ w1[F:, :] + b1   (per-relation msg term)
    """
    h = h_ref[...]                       # (G, N, F)
    adj = graph_ref[0]                   # (G, N, N)  adj[g,i,j]=1 iff edge j->i
    etf = graph_ref[1]                   # (G, N, N)  relation id as f32

    node = jax.lax.broadcasted_iota(jnp.int32, (1, N, 1), 1)
    dst_masks = (node < num_wkr,
                 (node >= num_wkr) & (node < num_wkr + num_tsk))
    coefs = ((0.5, 1.0), (0.3, 0.7))     # (self_coef, agg_coef) per phase

    for p in range(2):                   # static unroll: workers pull, then tasks
        w1h = wslab_ref[p, 0:F, :]                            # (F, F)
        w2 = wslab_ref[p, F:2 * F, :]                         # (F, F)
        b2 = wslab_ref[p, 2 * F:2 * F + 1, :]                 # (1, F)
        w3m = wslab_ref[p, 2 * F + 8:2 * F + 9, :]            # (1, F)
        relc = wslab_ref[p, 2 * F + 16:2 * F + 16 + R, :]     # (R, F)

        # one (G*N, F) @ (F, F) MXU matmul for the whole block
        hf = h.reshape(G * N, F)
        msg_h = jnp.dot(hf, w1h, preferred_element_type=jnp.float32)

        # factored messages / per-source score terms: R*(G*N*F) sigmoids,
        # no (N, N, F) tensor is ever formed.
        M = []        # (G, N, F) per relation
        S = []        # (G, 1, N) per relation: S_r[g, j] = M_r[g, j] . w3[:F]
        onehot = []   # (G, N, N) per relation: edge-of-relation-r mask
        for r in range(R):
            m_r = jax.nn.sigmoid(msg_h + relc[r:r + 1, :])            # (G*N, F)
            m_r3 = m_r.reshape(G, N, F)
            s_r = jnp.sum(m_r3 * w3m[None, :, :], axis=-1)            # (G, N)
            M.append(m_r3)
            S.append(s_r[:, None, :])                                 # (G, 1, N)
            onehot.append(jnp.where(etf == float(r), adj, 0.0))       # (G, N, N)

        # attention scores: per-destination-constant terms cancel in softmax.
        sc = onehot[0] * S[0]
        for r in range(1, R):
            sc = sc + onehot[r] * S[r]
        sc = jnp.where(adj > 0.0, sc, -1e30)
        ex = jnp.exp(sc - jnp.max(sc, axis=-1, keepdims=True)) * adj  # (G, N, N)
        denom = jnp.sum(ex, axis=-1, keepdims=True)                   # (G, N, 1)

        # aggregation as R batched (N, N) @ (N, F) MXU matmuls
        agg = jnp.einsum('gij,gjf->gif', ex * onehot[0], M[0],
                         preferred_element_type=jnp.float32)
        for r in range(1, R):
            agg = agg + jnp.einsum('gij,gjf->gif', ex * onehot[r], M[r],
                                   preferred_element_type=jnp.float32)

        # exact softmax normalization (tiny (G, N, 1) reciprocal, then scale)
        inv = 1.0 / jnp.maximum(denom, 1e-30)
        agg = agg * inv

        self_c, agg_c = coefs[p]
        pre = (agg_c * agg + self_c * h).reshape(G * N, F)
        h_new = jax.nn.sigmoid(
            jnp.dot(pre, w2, preferred_element_type=jnp.float32) + b2
        ).reshape(G, N, F)

        # only destination nodes with >= 1 incoming edge update; denom >= 1 iff
        # the row has any edge (its argmax term is exp(0) * 1), else denom == 0.
        keep = (denom > 0.5) & dst_masks[p]
        h = jnp.where(keep, h_new, h)

    out_ref[...] = h


@functools.partial(jax.jit,
                   static_argnames=("num_wkr", "num_tsk", "graphs_per_block"))
def mpnn2_forward(features, adj, etype, params, num_wkr, num_tsk,
                  graphs_per_block=4):
    """Pallas forward for a batch of graphs.

    features: (B, N, 1, F) (each graph laid out like the torch module's input)
    adj, etype: (B, N, N) with adj[g, i, j] = 1 iff edge j -> i, etype in [0, R)
    returns (B, N, 1, F)
    """
    h = features[:, :, 0, :].astype(jnp.float32)          # (B, N, F)
    B, N, F = h.shape
    R = params["e_wkr"].shape[0]
    G = graphs_per_block
    assert B % G == 0, "batch must be a multiple of graphs_per_block"
    assert F % 8 == 0, "feat_dim must be a multiple of 8 for slab alignment"

    adj = adj.astype(jnp.float32)
    # one lane-dense graph slab: adjacency + relation id (exact small ints, f32)
    graph = jnp.stack([adj, etype.astype(jnp.float32)])   # (2, B, N, N)

    # pack all per-phase weights into one 8-row-aligned slab; fold b1 and the
    # per-relation embedding contribution (e_r @ w1[F:, :]) into R rows so the
    # kernel never touches O(N^2 * e_dim) pre-gathered edge embeddings.
    rel_pad = (-R) % 8

    def pack_phase(w1, b1, w2, b2, w3, e):
        relc = jnp.dot(e[:, 0, :], w1[F:, :]) + b1                    # (R, F)
        z7 = jnp.zeros((7, F), jnp.float32)
        zr = jnp.zeros((rel_pad, F), jnp.float32)
        return jnp.concatenate(
            [w1[:F, :], w2, b2, z7, w3[:F, :].T, z7, relc, zr], axis=0)

    wslab = jnp.stack([
        pack_phase(params["w1_wkr"], params["b1_wkr"], params["w2_wkr"],
                   params["b2_wkr"], params["w3_wkr"], params["e_wkr"]),
        pack_phase(params["w1_tsk"], params["b1_tsk"], params["w2_tsk"],
                   params["b2_tsk"], params["w3_tsk"], params["e_tsk"]),
    ])                                                                # (2, P, F)
    P = wslab.shape[1]

    kernel = functools.partial(_mpnn2_kernel, G=G, N=N, F=F, R=R,
                               num_wkr=num_wkr, num_tsk=num_tsk)

    cost = pl.CostEstimate(
        flops=2 * (4 * B * N * F * F + 2 * R * B * N * N * F),
        transcendentals=2 * ((R + 1) * B * N * F + B * N * N),
        bytes_accessed=4 * (2 * B * N * F + 2 * B * N * N + 2 * P * F),
    )

    out = pl.pallas_call(
        kernel,
        out_shape=jax.ShapeDtypeStruct((B, N, F), jnp.float32),
        grid=(B // G,),
        in_specs=[
            pl.BlockSpec((G, N, F), lambda b: (b, 0, 0)),
            pl.BlockSpec((2, G, N, N), lambda b: (0, b, 0, 0)),
            pl.BlockSpec((2, P, F), lambda b: (0, 0, 0)),
        ],
        out_specs=pl.BlockSpec((G, N, F), lambda b: (b, 0, 0)),
        compiler_params=pltpu.CompilerParams(
            dimension_semantics=("parallel",),
            vmem_limit_bytes=32 * 1024 * 1024,
        ),
        cost_estimate=cost,
    )(h, graph, wslab)
    return out[:, :, None, :]


def _mpnn2_single_reference(feat, adj, etype, params, num_wkr, num_tsk):
    """Pure-JAX reference implementing the literal MPNN_2 math on one graph."""
    h = feat[:, 0, :].astype(jnp.float32)
    N, F = h.shape
    adj = adj.astype(jnp.float32)
    row = jnp.arange(N)[:, None]
    dst = (row < num_wkr, (row >= num_wkr) & (row < num_wkr + num_tsk))
    coefs = ((0.5, 1.0), (0.3, 0.7))
    phase = (
        (params["w1_wkr"], params["b1_wkr"], params["w2_wkr"], params["b2_wkr"],
         params["w3_wkr"], params["b3_wkr"], params["e_wkr"]),
        (params["w1_tsk"], params["b1_tsk"], params["w2_tsk"], params["b2_tsk"],
         params["w3_tsk"], params["b3_tsk"], params["e_tsk"]),
    )
    for p in range(2):
        w1, b1, w2, b2, w3, b3, e = phase[p]
        e_ij = e[:, 0, :][etype]                                      # (N, N, e_dim)
        # msg[i, j] = sigmoid(cat(h_j, e_ij) @ w1 + b1)
        msg = jax.nn.sigmoid(jnp.dot(h, w1[:F, :])[None, :, :]
                             + jnp.einsum('ijk,kf->ijf', e_ij, w1[F:, :])
                             + b1[None, :, :])
        # score[i, j] = cat(msg_ij, h_i) @ w3 + b3
        score = (jnp.sum(msg * w3[:F, 0][None, None, :], axis=2)
                 + jnp.sum(h * w3[F:, 0][None, :], axis=1, keepdims=True)
                 + b3[0, 0])
        score = jnp.where(adj > 0.0, score, -1e30)
        ex = jnp.exp(score - score.max(axis=1, keepdims=True)) * adj
        denom = jnp.maximum(ex.sum(axis=1, keepdims=True), 1e-30)
        alpha = ex / denom
        agg = jnp.sum(msg * alpha[:, :, None], axis=1)
        self_c, agg_c = coefs[p]
        h_new = jax.nn.sigmoid(jnp.dot(agg_c * agg + self_c * h, w2) + b2)
        deg = adj.sum(axis=1, keepdims=True)
        h = jnp.where((deg > 0.0) & dst[p], h_new, h)
    return h[:, None, :]


def mpnn2_reference(features, adj, etype, params, num_wkr, num_tsk):
    fn = functools.partial(_mpnn2_single_reference, params=params,
                           num_wkr=num_wkr, num_tsk=num_tsk)
    return jax.vmap(fn)(features, adj, etype)


def _xavier_uniform(key, shape, gain):
    if len(shape) == 2:
        fan_in, fan_out = shape[1], shape[0]
    else:
        rf = int(np.prod(shape[2:]))
        fan_in, fan_out = shape[1] * rf, shape[0] * rf
    bound = gain * math.sqrt(6.0 / (fan_in + fan_out))
    return jax.random.uniform(key, shape, jnp.float32, -bound, bound)


def init_params(key, feat_dim, num_rels, e_dim):
    gain = math.sqrt(2.0)  # relu gain
    names_shapes = [
        ("w1_wkr", (feat_dim + e_dim, feat_dim)), ("b1_wkr", (1, feat_dim)),
        ("w1_tsk", (feat_dim + e_dim, feat_dim)), ("b1_tsk", (1, feat_dim)),
        ("w2_wkr", (feat_dim, feat_dim)), ("b2_wkr", (1, feat_dim)),
        ("w2_tsk", (feat_dim, feat_dim)), ("b2_tsk", (1, feat_dim)),
        ("w3_wkr", (feat_dim * 2, 1)), ("b3_wkr", (1, 1)),
        ("w3_tsk", (feat_dim * 2, 1)), ("b3_tsk", (1, 1)),
        ("e_wkr", (num_rels, 1, e_dim)), ("e_tsk", (num_rels, 1, e_dim)),
    ]
    keys = jax.random.split(key, len(names_shapes))
    return {n: _xavier_uniform(k, s, gain) for (n, s), k in zip(names_shapes, keys)}


if __name__ == "__main__":
    feat_dim, e_dim, num_rels = 32, 16, 3
    num_wkr, num_tsk = 4, 4
    N = num_wkr + num_tsk
    B = 8                      # graphs per call; grid = 2 blocks of 4 graphs

    key = jax.random.PRNGKey(0)
    k_param, k_feat, k_adj, k_type = jax.random.split(key, 4)

    params = init_params(k_param, feat_dim, num_rels, e_dim)
    features = jax.random.normal(k_feat, (B, N, 1, feat_dim), jnp.float32)

    # dense random directed graphs (adj[g, i, j] = 1 means edge j -> i), no self loops
    adj = (jax.random.uniform(k_adj, (B, N, N)) < 0.5).astype(jnp.float32)
    adj = adj * (1.0 - jnp.eye(N, dtype=jnp.float32))[None, :, :]
    etype = jax.random.randint(k_type, (B, N, N), 0, num_rels)

    out = mpnn2_forward(features, adj, etype, params,
                        num_wkr=num_wkr, num_tsk=num_tsk, graphs_per_block=4)
    out = jax.block_until_ready(out)

    ref = jax.block_until_ready(
        mpnn2_reference(features, adj, etype, params, num_wkr, num_tsk))
    np.testing.assert_allclose(np.asarray(out), np.asarray(ref),
                               rtol=1e-3, atol=1e-3)
    print("KERNEL_OK")
</pallas_src>

<mosaic_0001>
module attributes {stable_mosaic.version = 11 : i64} {
  func.func @_mpnn2_kernel(%arg0: i32, %arg1: memref<4x8x32xf32, #tpu.memory_space<vmem>>, %arg2: memref<2x4x8x8xf32, #tpu.memory_space<vmem>>, %arg3: memref<2x88x32xf32, #tpu.memory_space<vmem>>, %arg4: memref<4x8x32xf32, #tpu.memory_space<vmem>>) attributes {dimension_semantics = [#tpu.dimension_semantics<parallel>], iteration_bounds = array<i64: 2>, scalar_prefetch = 0 : i64, scratch_operands = 0 : i64, tpu.core_type = #tpu.core_type<tc>, window_params = [{transform_indices = @transform_0, window_bounds = array<i64: 4, 8, 32>}, {transform_indices = @transform_1, window_bounds = array<i64: 2, 4, 8, 8>}, {pipeline_mode = #tpu.pipeline_mode<synchronous>, transform_indices = @transform_2, window_bounds = array<i64: 2, 88, 32>}, {transform_indices = @transform_3, window_bounds = array<i64: 4, 8, 32>}]} {
    %c0 = arith.constant 0 : index
    %c0_0 = arith.constant 0 : index
    %c0_1 = arith.constant 0 : index
    %0 = vector.load %arg1[%c0, %c0_0, %c0_1] : memref<4x8x32xf32, #tpu.memory_space<vmem>>, vector<4x8x32xf32>
    %c0_2 = arith.constant 0 : index
    %c0_3 = arith.constant 0 : index
    %c0_4 = arith.constant 0 : index
    %c0_5 = arith.constant 0 : index
    %1 = vector.load %arg2[%c0_2, %c0_3, %c0_4, %c0_5] : memref<2x4x8x8xf32, #tpu.memory_space<vmem>>, vector<1x4x8x8xf32>
    %2 = vector.shape_cast %1 : vector<1x4x8x8xf32> to vector<4x8x8xf32>
    %c1 = arith.constant 1 : index
    %c0_6 = arith.constant 0 : index
    %c0_7 = arith.constant 0 : index
    %c0_8 = arith.constant 0 : index
    %3 = vector.load %arg2[%c1, %c0_6, %c0_7, %c0_8] : memref<2x4x8x8xf32, #tpu.memory_space<vmem>>, vector<1x4x8x8xf32>
    %4 = vector.shape_cast %3 : vector<1x4x8x8xf32> to vector<4x8x8xf32>
    %5 = tpu.iota {dimensions = array<i32: 1>} : vector<1x8x1xi32>
    %c4_i32 = arith.constant 4 : i32
    %6 = vector.broadcast %c4_i32 : i32 to vector<1x8x1xi32>
    %7 = arith.cmpi slt, %5, %6 : vector<1x8x1xi32>
    %c4_i32_9 = arith.constant 4 : i32
    %8 = vector.broadcast %c4_i32_9 : i32 to vector<1x8x1xi32>
    %9 = arith.cmpi sge, %5, %8 : vector<1x8x1xi32>
    %c8_i32 = arith.constant 8 : i32
    %10 = vector.broadcast %c8_i32 : i32 to vector<1x8x1xi32>
    %11 = arith.cmpi slt, %5, %10 : vector<1x8x1xi32>
    %12 = arith.andi %9, %11 : vector<1x8x1xi1>
    %c0_10 = arith.constant 0 : index
    %c0_11 = arith.constant 0 : index
    %c0_12 = arith.constant 0 : index
    %13 = vector.load %arg3[%c0_10, %c0_11, %c0_12] : memref<2x88x32xf32, #tpu.memory_space<vmem>>, vector<1x32x32xf32>
    %14 = vector.shape_cast %13 : vector<1x32x32xf32> to vector<32x32xf32>
    %c0_13 = arith.constant 0 : index
    %c32 = arith.constant 32 : index
    %c0_14 = arith.constant 0 : index
    %15 = vector.load %arg3[%c0_13, %c32, %c0_14] : memref<2x88x32xf32, #tpu.memory_space<vmem>>, vector<1x32x32xf32>
    %16 = vector.shape_cast %15 : vector<1x32x32xf32> to vector<32x32xf32>
    %c0_15 = arith.constant 0 : index
    %c64 = arith.constant 64 : index
    %c0_16 = arith.constant 0 : index
    %17 = vector.load %arg3[%c0_15, %c64, %c0_16] : memref<2x88x32xf32, #tpu.memory_space<vmem>>, vector<1x1x32xf32>
    %18 = vector.shape_cast %17 : vector<1x1x32xf32> to vector<1x32xf32>
    %c0_17 = arith.constant 0 : index
    %c72 = arith.constant 72 : index
    %c0_18 = arith.constant 0 : index
    %19 = vector.load %arg3[%c0_17, %c72, %c0_18] : memref<2x88x32xf32, #tpu.memory_space<vmem>>, vector<1x1x32xf32>
    %20 = vector.shape_cast %19 : vector<1x1x32xf32> to vector<1x32xf32>
    %c0_19 = arith.constant 0 : index
    %c80 = arith.constant 80 : index
    %c0_20 = arith.constant 0 : index
    %21 = vector.load %arg3[%c0_19, %c80, %c0_20] : memref<2x88x32xf32, #tpu.memory_space<vmem>>, vector<1x3x32xf32>
    %22 = vector.shape_cast %21 : vector<1x3x32xf32> to vector<3x32xf32>
    %23 = vector.shape_cast %0 : vector<4x8x32xf32> to vector<32x32xf32>
    %cst = arith.constant dense<0.000000e+00> : vector<32x32xf32>
    %24 = tpu.matmul %23, %14, %cst {dimension_numbers = #tpu.dot_dimension_numbers<[1], [0], [0], [1], [0, 0, 1, 1], [], []>} : vector<32x32xf32>, vector<32x32xf32>, vector<32x32xf32> -> vector<32x32xf32>
    %25 = vector.extract_strided_slice %22 {offsets = [0, 0], sizes = [1, 32], strides = [1, 1]} : vector<3x32xf32> to vector<1x32xf32>
    %26 = vector.broadcast %25 : vector<1x32xf32> to vector<32x32xf32>
    %27 = arith.addf %24, %26 : vector<32x32xf32>
    %28 = arith.negf %27 : vector<32x32xf32>
    %29 = math.exp %28 : vector<32x32xf32>
    %cst_21 = arith.constant 1.000000e+00 : f32
    %30 = vector.broadcast %cst_21 : f32 to vector<32x32xf32>
    %31 = arith.addf %30, %29 : vector<32x32xf32>
    %32 = arith.divf %30, %31 : vector<32x32xf32>
    %33 = vector.shape_cast %32 : vector<32x32xf32> to vector<4x8x32xf32>
    %34 = vector.shape_cast %20 : vector<1x32xf32> to vector<1x1x32xf32>
    %35 = vector.broadcast %34 : vector<1x1x32xf32> to vector<4x8x32xf32>
    %36 = arith.mulf %33, %35 : vector<4x8x32xf32>
    %cst_22 = arith.constant dense<0.000000e+00> : vector<4x8xf32>
    %37 = vector.multi_reduction <add>, %36, %cst_22 [2] : vector<4x8x32xf32> to vector<4x8xf32>
    %38 = vector.shape_cast %37 : vector<4x8xf32> to vector<4x1x8xf32>
    %cst_23 = arith.constant 0.000000e+00 : f32
    %39 = vector.broadcast %cst_23 : f32 to vector<4x8x8xf32>
    %40 = arith.cmpf oeq, %4, %39 : vector<4x8x8xf32>
    %cst_24 = arith.constant 0.000000e+00 : f32
    %41 = vector.broadcast %cst_24 : f32 to vector<4x8x8xf32>
    %42 = arith.select %40, %2, %41 : vector<4x8x8xi1>, vector<4x8x8xf32>
    %43 = vector.extract_strided_slice %22 {offsets = [1, 0], sizes = [1, 32], strides = [1, 1]} : vector<3x32xf32> to vector<1x32xf32>
    %44 = vector.broadcast %43 : vector<1x32xf32> to vector<32x32xf32>
    %45 = arith.addf %24, %44 : vector<32x32xf32>
    %46 = arith.negf %45 : vector<32x32xf32>
    %47 = math.exp %46 : vector<32x32xf32>
    %cst_25 = arith.constant 1.000000e+00 : f32
    %48 = vector.broadcast %cst_25 : f32 to vector<32x32xf32>
    %49 = arith.addf %48, %47 : vector<32x32xf32>
    %50 = arith.divf %48, %49 : vector<32x32xf32>
    %51 = vector.shape_cast %50 : vector<32x32xf32> to vector<4x8x32xf32>
    %52 = vector.shape_cast %20 : vector<1x32xf32> to vector<1x1x32xf32>
    %53 = vector.broadcast %52 : vector<1x1x32xf32> to vector<4x8x32xf32>
    %54 = arith.mulf %51, %53 : vector<4x8x32xf32>
    %cst_26 = arith.constant dense<0.000000e+00> : vector<4x8xf32>
    %55 = vector.multi_reduction <add>, %54, %cst_26 [2] : vector<4x8x32xf32> to vector<4x8xf32>
    %56 = vector.shape_cast %55 : vector<4x8xf32> to vector<4x1x8xf32>
    %cst_27 = arith.constant 1.000000e+00 : f32
    %57 = vector.broadcast %cst_27 : f32 to vector<4x8x8xf32>
    %58 = arith.cmpf oeq, %4, %57 : vector<4x8x8xf32>
    %cst_28 = arith.constant 0.000000e+00 : f32
    %59 = vector.broadcast %cst_28 : f32 to vector<4x8x8xf32>
    %60 = arith.select %58, %2, %59 : vector<4x8x8xi1>, vector<4x8x8xf32>
    %61 = vector.extract_strided_slice %22 {offsets = [2, 0], sizes = [1, 32], strides = [1, 1]} : vector<3x32xf32> to vector<1x32xf32>
    %62 = vector.broadcast %61 : vector<1x32xf32> to vector<32x32xf32>
    %63 = arith.addf %24, %62 : vector<32x32xf32>
    %64 = arith.negf %63 : vector<32x32xf32>
    %65 = math.exp %64 : vector<32x32xf32>
    %cst_29 = arith.constant 1.000000e+00 : f32
    %66 = vector.broadcast %cst_29 : f32 to vector<32x32xf32>
    %67 = arith.addf %66, %65 : vector<32x32xf32>
    %68 = arith.divf %66, %67 : vector<32x32xf32>
    %69 = vector.shape_cast %68 : vector<32x32xf32> to vector<4x8x32xf32>
    %70 = vector.shape_cast %20 : vector<1x32xf32> to vector<1x1x32xf32>
    %71 = vector.broadcast %70 : vector<1x1x32xf32> to vector<4x8x32xf32>
    %72 = arith.mulf %69, %71 : vector<4x8x32xf32>
    %cst_30 = arith.constant dense<0.000000e+00> : vector<4x8xf32>
    %73 = vector.multi_reduction <add>, %72, %cst_30 [2] : vector<4x8x32xf32> to vector<4x8xf32>
    %74 = vector.shape_cast %73 : vector<4x8xf32> to vector<4x1x8xf32>
    %cst_31 = arith.constant 2.000000e+00 : f32
    %75 = vector.broadcast %cst_31 : f32 to vector<4x8x8xf32>
    %76 = arith.cmpf oeq, %4, %75 : vector<4x8x8xf32>
    %cst_32 = arith.constant 0.000000e+00 : f32
    %77 = vector.broadcast %cst_32 : f32 to vector<4x8x8xf32>
    %78 = arith.select %76, %2, %77 : vector<4x8x8xi1>, vector<4x8x8xf32>
    %79 = vector.broadcast %38 : vector<4x1x8xf32> to vector<4x8x8xf32>
    %80 = arith.mulf %42, %79 : vector<4x8x8xf32>
    %81 = vector.broadcast %56 : vector<4x1x8xf32> to vector<4x8x8xf32>
    %82 = arith.mulf %60, %81 : vector<4x8x8xf32>
    %83 = arith.addf %80, %82 : vector<4x8x8xf32>
    %84 = vector.broadcast %74 : vector<4x1x8xf32> to vector<4x8x8xf32>
    %85 = arith.mulf %78, %84 : vector<4x8x8xf32>
    %86 = arith.addf %83, %85 : vector<4x8x8xf32>
    %cst_33 = arith.constant 0.000000e+00 : f32
    %87 = vector.broadcast %cst_33 : f32 to vector<4x8x8xf32>
    %88 = arith.cmpf ogt, %2, %87 : vector<4x8x8xf32>
    %cst_34 = arith.constant -1.000000e+30 : f32
    %89 = vector.broadcast %cst_34 : f32 to vector<4x8x8xf32>
    %90 = arith.select %88, %86, %89 : vector<4x8x8xi1>, vector<4x8x8xf32>
    %cst_35 = arith.constant dense<0xFF800000> : vector<4x8xf32>
    %91 = vector.multi_reduction <maximumf>, %90, %cst_35 [2] : vector<4x8x8xf32> to vector<4x8xf32>
    %92 = vector.shape_cast %91 : vector<4x8xf32> to vector<4x8x1xf32>
    %93 = vector.broadcast %92 : vector<4x8x1xf32> to vector<4x8x8xf32>
    %94 = arith.subf %90, %93 : vector<4x8x8xf32>
    %95 = math.exp %94 : vector<4x8x8xf32>
    %96 = arith.mulf %95, %2 : vector<4x8x8xf32>
    %cst_36 = arith.constant dense<0.000000e+00> : vector<4x8xf32>
    %97 = vector.multi_reduction <add>, %96, %cst_36 [2] : vector<4x8x8xf32> to vector<4x8xf32>
    %98 = vector.shape_cast %97 : vector<4x8xf32> to vector<4x8x1xf32>
    %99 = arith.mulf %96, %42 : vector<4x8x8xf32>
    "tpu.trace_start"() <{level = 10 : i32, message = "gij,gjf->gif"}> : () -> ()
    %cst_37 = arith.constant dense<0.000000e+00> : vector<4x8x32xf32>
    %100 = tpu.matmul %99, %33, %cst_37 {dimension_numbers = #tpu.dot_dimension_numbers<[2], [1], [1], [2], [0, 0, 0, 1, 1, 2], [0], [0]>} : vector<4x8x8xf32>, vector<4x8x32xf32>, vector<4x8x32xf32> -> vector<4x8x32xf32>
    "tpu.trace_stop"() : () -> ()
    %101 = arith.mulf %96, %60 : vector<4x8x8xf32>
    "tpu.trace_start"() <{level = 10 : i32, message = "gij,gjf->gif"}> : () -> ()
    %cst_38 = arith.constant dense<0.000000e+00> : vector<4x8x32xf32>
    %102 = tpu.matmul %101, %51, %cst_38 {dimension_numbers = #tpu.dot_dimension_numbers<[2], [1], [1], [2], [0, 0, 0, 1, 1, 2], [0], [0]>} : vector<4x8x8xf32>, vector<4x8x32xf32>, vector<4x8x32xf32> -> vector<4x8x32xf32>
    "tpu.trace_stop"() : () -> ()
    %103 = arith.addf %100, %102 : vector<4x8x32xf32>
    %104 = arith.mulf %96, %78 : vector<4x8x8xf32>
    "tpu.trace_start"() <{level = 10 : i32, message = "gij,gjf->gif"}> : () -> ()
    %cst_39 = arith.constant dense<0.000000e+00> : vector<4x8x32xf32>
    %105 = tpu.matmul %104, %69, %cst_39 {dimension_numbers = #tpu.dot_dimension_numbers<[2], [1], [1], [2], [0, 0, 0, 1, 1, 2], [0], [0]>} : vector<4x8x8xf32>, vector<4x8x32xf32>, vector<4x8x32xf32> -> vector<4x8x32xf32>
    "tpu.trace_stop"() : () -> ()
    %106 = arith.addf %103, %105 : vector<4x8x32xf32>
    %cst_40 = arith.constant 1.000000e-30 : f32
    %107 = vector.broadcast %cst_40 : f32 to vector<4x8x1xf32>
    %108 = arith.maximumf %98, %107 : vector<4x8x1xf32>
    %cst_41 = arith.constant 1.000000e+00 : f32
    %109 = vector.broadcast %cst_41 : f32 to vector<4x8x1xf32>
    %110 = arith.divf %109, %108 : vector<4x8x1xf32>
    %111 = vector.broadcast %110 : vector<4x8x1xf32> to vector<4x8x32xf32>
    %112 = arith.mulf %106, %111 : vector<4x8x32xf32>
    %cst_42 = arith.constant 1.000000e+00 : f32
    %113 = vector.broadcast %cst_42 : f32 to vector<4x8x32xf32>
    %114 = arith.mulf %113, %112 : vector<4x8x32xf32>
    %cst_43 = arith.constant 5.000000e-01 : f32
    %115 = vector.broadcast %cst_43 : f32 to vector<4x8x32xf32>
    %116 = arith.mulf %115, %0 : vector<4x8x32xf32>
    %117 = arith.addf %114, %116 : vector<4x8x32xf32>
    %118 = vector.shape_cast %117 : vector<4x8x32xf32> to vector<32x32xf32>
    %cst_44 = arith.constant dense<0.000000e+00> : vector<32x32xf32>
    %119 = tpu.matmul %118, %16, %cst_44 {dimension_numbers = #tpu.dot_dimension_numbers<[1], [0], [0], [1], [0, 0, 1, 1], [], []>} : vector<32x32xf32>, vector<32x32xf32>, vector<32x32xf32> -> vector<32x32xf32>
    %120 = vector.broadcast %18 : vector<1x32xf32> to vector<32x32xf32>
    %121 = arith.addf %119, %120 : vector<32x32xf32>
    %122 = arith.negf %121 : vector<32x32xf32>
    %123 = math.exp %122 : vector<32x32xf32>
    %cst_45 = arith.constant 1.000000e+00 : f32
    %124 = vector.broadcast %cst_45 : f32 to vector<32x32xf32>
    %125 = arith.addf %124, %123 : vector<32x32xf32>
    %126 = arith.divf %124, %125 : vector<32x32xf32>
    %127 = vector.shape_cast %126 : vector<32x32xf32> to vector<4x8x32xf32>
    %cst_46 = arith.constant 5.000000e-01 : f32
    %128 = vector.broadcast %cst_46 : f32 to vector<4x8x1xf32>
    %129 = arith.cmpf ogt, %98, %128 : vector<4x8x1xf32>
    %130 = vector.broadcast %7 : vector<1x8x1xi1> to vector<4x8x1xi1>
    %131 = arith.andi %129, %130 : vector<4x8x1xi1>
    %132 = vector.shape_cast %131 : vector<4x8x1xi1> to vector<4x8x1xi1>
    %133 = vector.broadcast %132 : vector<4x8x1xi1> to vector<4x8x32xi1>
    %134 = arith.select %133, %127, %0 : vector<4x8x32xi1>, vector<4x8x32xf32>
    %c1_47 = arith.constant 1 : index
    %c0_48 = arith.constant 0 : index
    %c0_49 = arith.constant 0 : index
    %135 = vector.load %arg3[%c1_47, %c0_48, %c0_49] : memref<2x88x32xf32, #tpu.memory_space<vmem>>, vector<1x32x32xf32>
    %136 = vector.shape_cast %135 : vector<1x32x32xf32> to vector<32x32xf32>
    %c1_50 = arith.constant 1 : index
    %c32_51 = arith.constant 32 : index
    %c0_52 = arith.constant 0 : index
    %137 = vector.load %arg3[%c1_50, %c32_51, %c0_52] : memref<2x88x32xf32, #tpu.memory_space<vmem>>, vector<1x32x32xf32>
    %138 = vector.shape_cast %137 : vector<1x32x32xf32> to vector<32x32xf32>
    %c1_53 = arith.constant 1 : index
    %c64_54 = arith.constant 64 : index
    %c0_55 = arith.constant 0 : index
    %139 = vector.load %arg3[%c1_53, %c64_54, %c0_55] : memref<2x88x32xf32, #tpu.memory_space<vmem>>, vector<1x1x32xf32>
    %140 = vector.shape_cast %139 : vector<1x1x32xf32> to vector<1x32xf32>
    %c1_56 = arith.constant 1 : index
    %c72_57 = arith.constant 72 : index
    %c0_58 = arith.constant 0 : index
    %141 = vector.load %arg3[%c1_56, %c72_57, %c0_58] : memref<2x88x32xf32, #tpu.memory_space<vmem>>, vector<1x1x32xf32>
    %142 = vector.shape_cast %141 : vector<1x1x32xf32> to vector<1x32xf32>
    %c1_59 = arith.constant 1 : index
    %c80_60 = arith.constant 80 : index
    %c0_61 = arith.constant 0 : index
    %143 = vector.load %arg3[%c1_59, %c80_60, %c0_61] : memref<2x88x32xf32, #tpu.memory_space<vmem>>, vector<1x3x32xf32>
    %144 = vector.shape_cast %143 : vector<1x3x32xf32> to vector<3x32xf32>
    %145 = vector.shape_cast %134 : vector<4x8x32xf32> to vector<32x32xf32>
    %cst_62 = arith.constant dense<0.000000e+00> : vector<32x32xf32>
    %146 = tpu.matmul %145, %136, %cst_62 {dimension_numbers = #tpu.dot_dimension_numbers<[1], [0], [0], [1], [0, 0, 1, 1], [], []>} : vector<32x32xf32>, vector<32x32xf32>, vector<32x32xf32> -> vector<32x32xf32>
    %147 = vector.extract_strided_slice %144 {offsets = [0, 0], sizes = [1, 32], strides = [1, 1]} : vector<3x32xf32> to vector<1x32xf32>
    %148 = vector.broadcast %147 : vector<1x32xf32> to vector<32x32xf32>
    %149 = arith.addf %146, %148 : vector<32x32xf32>
    %150 = arith.negf %149 : vector<32x32xf32>
    %151 = math.exp %150 : vector<32x32xf32>
    %cst_63 = arith.constant 1.000000e+00 : f32
    %152 = vector.broadcast %cst_63 : f32 to vector<32x32xf32>
    %153 = arith.addf %152, %151 : vector<32x32xf32>
    %154 = arith.divf %152, %153 : vector<32x32xf32>
    %155 = vector.shape_cast %154 : vector<32x32xf32> to vector<4x8x32xf32>
    %156 = vector.shape_cast %142 : vector<1x32xf32> to vector<1x1x32xf32>
    %157 = vector.broadcast %156 : vector<1x1x32xf32> to vector<4x8x32xf32>
    %158 = arith.mulf %155, %157 : vector<4x8x32xf32>
    %cst_64 = arith.constant dense<0.000000e+00> : vector<4x8xf32>
    %159 = vector.multi_reduction <add>, %158, %cst_64 [2] : vector<4x8x32xf32> to vector<4x8xf32>
    %160 = vector.shape_cast %159 : vector<4x8xf32> to vector<4x1x8xf32>
    %cst_65 = arith.constant 0.000000e+00 : f32
    %161 = vector.broadcast %cst_65 : f32 to vector<4x8x8xf32>
    %162 = arith.cmpf oeq, %4, %161 : vector<4x8x8xf32>
    %cst_66 = arith.constant 0.000000e+00 : f32
    %163 = vector.broadcast %cst_66 : f32 to vector<4x8x8xf32>
    %164 = arith.select %162, %2, %163 : vector<4x8x8xi1>, vector<4x8x8xf32>
    %165 = vector.extract_strided_slice %144 {offsets = [1, 0], sizes = [1, 32], strides = [1, 1]} : vector<3x32xf32> to vector<1x32xf32>
    %166 = vector.broadcast %165 : vector<1x32xf32> to vector<32x32xf32>
    %167 = arith.addf %146, %166 : vector<32x32xf32>
    %168 = arith.negf %167 : vector<32x32xf32>
    %169 = math.exp %168 : vector<32x32xf32>
    %cst_67 = arith.constant 1.000000e+00 : f32
    %170 = vector.broadcast %cst_67 : f32 to vector<32x32xf32>
    %171 = arith.addf %170, %169 : vector<32x32xf32>
    %172 = arith.divf %170, %171 : vector<32x32xf32>
    %173 = vector.shape_cast %172 : vector<32x32xf32> to vector<4x8x32xf32>
    %174 = vector.shape_cast %142 : vector<1x32xf32> to vector<1x1x32xf32>
    %175 = vector.broadcast %174 : vector<1x1x32xf32> to vector<4x8x32xf32>
    %176 = arith.mulf %173, %175 : vector<4x8x32xf32>
    %cst_68 = arith.constant dense<0.000000e+00> : vector<4x8xf32>
    %177 = vector.multi_reduction <add>, %176, %cst_68 [2] : vector<4x8x32xf32> to vector<4x8xf32>
    %178 = vector.shape_cast %177 : vector<4x8xf32> to vector<4x1x8xf32>
    %cst_69 = arith.constant 1.000000e+00 : f32
    %179 = vector.broadcast %cst_69 : f32 to vector<4x8x8xf32>
    %180 = arith.cmpf oeq, %4, %179 : vector<4x8x8xf32>
    %cst_70 = arith.constant 0.000000e+00 : f32
    %181 = vector.broadcast %cst_70 : f32 to vector<4x8x8xf32>
    %182 = arith.select %180, %2, %181 : vector<4x8x8xi1>, vector<4x8x8xf32>
    %183 = vector.extract_strided_slice %144 {offsets = [2, 0], sizes = [1, 32], strides = [1, 1]} : vector<3x32xf32> to vector<1x32xf32>
    %184 = vector.broadcast %183 : vector<1x32xf32> to vector<32x32xf32>
    %185 = arith.addf %146, %184 : vector<32x32xf32>
    %186 = arith.negf %185 : vector<32x32xf32>
    %187 = math.exp %186 : vector<32x32xf32>
    %cst_71 = arith.constant 1.000000e+00 : f32
    %188 = vector.broadcast %cst_71 : f32 to vector<32x32xf32>
    %189 = arith.addf %188, %187 : vector<32x32xf32>
    %190 = arith.divf %188, %189 : vector<32x32xf32>
    %191 = vector.shape_cast %190 : vector<32x32xf32> to vector<4x8x32xf32>
    %192 = vector.shape_cast %142 : vector<1x32xf32> to vector<1x1x32xf32>
    %193 = vector.broadcast %192 : vector<1x1x32xf32> to vector<4x8x32xf32>
    %194 = arith.mulf %191, %193 : vector<4x8x32xf32>
    %cst_72 = arith.constant dense<0.000000e+00> : vector<4x8xf32>
    %195 = vector.multi_reduction <add>, %194, %cst_72 [2] : vector<4x8x32xf32> to vector<4x8xf32>
    %196 = vector.shape_cast %195 : vector<4x8xf32> to vector<4x1x8xf32>
    %cst_73 = arith.constant 2.000000e+00 : f32
    %197 = vector.broadcast %cst_73 : f32 to vector<4x8x8xf32>
    %198 = arith.cmpf oeq, %4, %197 : vector<4x8x8xf32>
    %cst_74 = arith.constant 0.000000e+00 : f32
    %199 = vector.broadcast %cst_74 : f32 to vector<4x8x8xf32>
    %200 = arith.select %198, %2, %199 : vector<4x8x8xi1>, vector<4x8x8xf32>
    %201 = vector.broadcast %160 : vector<4x1x8xf32> to vector<4x8x8xf32>
    %202 = arith.mulf %164, %201 : vector<4x8x8xf32>
    %203 = vector.broadcast %178 : vector<4x1x8xf32> to vector<4x8x8xf32>
    %204 = arith.mulf %182, %203 : vector<4x8x8xf32>
    %205 = arith.addf %202, %204 : vector<4x8x8xf32>
    %206 = vector.broadcast %196 : vector<4x1x8xf32> to vector<4x8x8xf32>
    %207 = arith.mulf %200, %206 : vector<4x8x8xf32>
    %208 = arith.addf %205, %207 : vector<4x8x8xf32>
    %cst_75 = arith.constant 0.000000e+00 : f32
    %209 = vector.broadcast %cst_75 : f32 to vector<4x8x8xf32>
    %210 = arith.cmpf ogt, %2, %209 : vector<4x8x8xf32>
    %cst_76 = arith.constant -1.000000e+30 : f32
    %211 = vector.broadcast %cst_76 : f32 to vector<4x8x8xf32>
    %212 = arith.select %210, %208, %211 : vector<4x8x8xi1>, vector<4x8x8xf32>
    %cst_77 = arith.constant dense<0xFF800000> : vector<4x8xf32>
    %213 = vector.multi_reduction <maximumf>, %212, %cst_77 [2] : vector<4x8x8xf32> to vector<4x8xf32>
    %214 = vector.shape_cast %213 : vector<4x8xf32> to vector<4x8x1xf32>
    %215 = vector.broadcast %214 : vector<4x8x1xf32> to vector<4x8x8xf32>
    %216 = arith.subf %212, %215 : vector<4x8x8xf32>
    %217 = math.exp %216 : vector<4x8x8xf32>
    %218 = arith.mulf %217, %2 : vector<4x8x8xf32>
    %cst_78 = arith.constant dense<0.000000e+00> : vector<4x8xf32>
    %219 = vector.multi_reduction <add>, %218, %cst_78 [2] : vector<4x8x8xf32> to vector<4x8xf32>
    %220 = vector.shape_cast %219 : vector<4x8xf32> to vector<4x8x1xf32>
    %221 = arith.mulf %218, %164 : vector<4x8x8xf32>
    "tpu.trace_start"() <{level = 10 : i32, message = "gij,gjf->gif"}> : () -> ()
    %cst_79 = arith.constant dense<0.000000e+00> : vector<4x8x32xf32>
    %222 = tpu.matmul %221, %155, %cst_79 {dimension_numbers = #tpu.dot_dimension_numbers<[2], [1], [1], [2], [0, 0, 0, 1, 1, 2], [0], [0]>} : vector<4x8x8xf32>, vector<4x8x32xf32>, vector<4x8x32xf32> -> vector<4x8x32xf32>
    "tpu.trace_stop"() : () -> ()
    %223 = arith.mulf %218, %182 : vector<4x8x8xf32>
    "tpu.trace_start"() <{level = 10 : i32, message = "gij,gjf->gif"}> : () -> ()
    %cst_80 = arith.constant dense<0.000000e+00> : vector<4x8x32xf32>
    %224 = tpu.matmul %223, %173, %cst_80 {dimension_numbers = #tpu.dot_dimension_numbers<[2], [1], [1], [2], [0, 0, 0, 1, 1, 2], [0], [0]>} : vector<4x8x8xf32>, vector<4x8x32xf32>, vector<4x8x32xf32> -> vector<4x8x32xf32>
    "tpu.trace_stop"() : () -> ()
    %225 = arith.addf %222, %224 : vector<4x8x32xf32>
    %226 = arith.mulf %218, %200 : vector<4x8x8xf32>
    "tpu.trace_start"() <{level = 10 : i32, message = "gij,gjf->gif"}> : () -> ()
    %cst_81 = arith.constant dense<0.000000e+00> : vector<4x8x32xf32>
    %227 = tpu.matmul %226, %191, %cst_81 {dimension_numbers = #tpu.dot_dimension_numbers<[2], [1], [1], [2], [0, 0, 0, 1, 1, 2], [0], [0]>} : vector<4x8x8xf32>, vector<4x8x32xf32>, vector<4x8x32xf32> -> vector<4x8x32xf32>
    "tpu.trace_stop"() : () -> ()
    %228 = arith.addf %225, %227 : vector<4x8x32xf32>
    %cst_82 = arith.constant 1.000000e-30 : f32
    %229 = vector.broadcast %cst_82 : f32 to vector<4x8x1xf32>
    %230 = arith.maximumf %220, %229 : vector<4x8x1xf32>
    %cst_83 = arith.constant 1.000000e+00 : f32
    %231 = vector.broadcast %cst_83 : f32 to vector<4x8x1xf32>
    %232 = arith.divf %231, %230 : vector<4x8x1xf32>
    %233 = vector.broadcast %232 : vector<4x8x1xf32> to vector<4x8x32xf32>
    %234 = arith.mulf %228, %233 : vector<4x8x32xf32>
    %cst_84 = arith.constant 0.699999988 : f32
    %235 = vector.broadcast %cst_84 : f32 to vector<4x8x32xf32>
    %236 = arith.mulf %235, %234 : vector<4x8x32xf32>
    %cst_85 = arith.constant 3.000000e-01 : f32
    %237 = vector.broadcast %cst_85 : f32 to vector<4x8x32xf32>
    %238 = arith.mulf %237, %134 : vector<4x8x32xf32>
    %239 = arith.addf %236, %238 : vector<4x8x32xf32>
    %240 = vector.shape_cast %239 : vector<4x8x32xf32> to vector<32x32xf32>
    %cst_86 = arith.constant dense<0.000000e+00> : vector<32x32xf32>
    %241 = tpu.matmul %240, %138, %cst_86 {dimension_numbers = #tpu.dot_dimension_numbers<[1], [0], [0], [1], [0, 0, 1, 1], [], []>} : vector<32x32xf32>, vector<32x32xf32>, vector<32x32xf32> -> vector<32x32xf32>
    %242 = vector.broadcast %140 : vector<1x32xf32> to vector<32x32xf32>
    %243 = arith.addf %241, %242 : vector<32x32xf32>
    %244 = arith.negf %243 : vector<32x32xf32>
    %245 = math.exp %244 : vector<32x32xf32>
    %cst_87 = arith.constant 1.000000e+00 : f32
    %246 = vector.broadcast %cst_87 : f32 to vector<32x32xf32>
    %247 = arith.addf %246, %245 : vector<32x32xf32>
    %248 = arith.divf %246, %247 : vector<32x32xf32>
    %249 = vector.shape_cast %248 : vector<32x32xf32> to vector<4x8x32xf32>
    %cst_88 = arith.constant 5.000000e-01 : f32
    %250 = vector.broadcast %cst_88 : f32 to vector<4x8x1xf32>
    %251 = arith.cmpf ogt, %220, %250 : vector<4x8x1xf32>
    %252 = vector.broadcast %12 : vector<1x8x1xi1> to vector<4x8x1xi1>
    %253 = arith.andi %251, %252 : vector<4x8x1xi1>
    %254 = vector.shape_cast %253 : vector<4x8x1xi1> to vector<4x8x1xi1>
    %255 = vector.broadcast %254 : vector<4x8x1xi1> to vector<4x8x32xi1>
    %256 = arith.select %255, %249, %134 : vector<4x8x32xi1>, vector<4x8x32xf32>
    %c0_89 = arith.constant 0 : index
    %c0_90 = arith.constant 0 : index
    %c0_91 = arith.constant 0 : index
    %257 = vector.load %arg4[%c0_89, %c0_90, %c0_91] : memref<4x8x32xf32, #tpu.memory_space<vmem>>, vector<4x8x32xf32>
    tpu.vector_store %arg4[%c0_89, %c0_90, %c0_91], %256 {strides = array<i32>} : memref<4x8x32xf32, #tpu.memory_space<vmem>>, vector<4x8x32xf32>,
    return
  }
  func.func @transform_0(%arg0: i32) -> (i32, i32, i32) {
    %c0_i32 = arith.constant 0 : i32
    %c0_i32_0 = arith.constant 0 : i32
    %c0_i32_1 = arith.constant 0 : i32
    return %arg0, %c0_i32, %c0_i32_0 : i32, i32, i32
  }
  func.func @transform_1(%arg0: i32) -> (i32, i32, i32, i32) {
    %c0_i32 = arith.constant 0 : i32
    %c0_i32_0 = arith.constant 0 : i32
    %c0_i32_1 = arith.constant 0 : i32
    %c0_i32_2 = arith.constant 0 : i32
    return %c0_i32, %arg0, %c0_i32_0, %c0_i32_1 : i32, i32, i32, i32
  }
  func.func @transform_2(%arg0: i32) -> (i32, i32, i32) {
    %c0_i32 = arith.constant 0 : i32
    %c0_i32_0 = arith.constant 0 : i32
    %c0_i32_1 = arith.constant 0 : i32
    %c0_i32_2 = arith.constant 0 : i32
    return %c0_i32, %c0_i32_0, %c0_i32_1 : i32, i32, i32
  }
  func.func @transform_3(%arg0: i32) -> (i32, i32, i32) {
    %c0_i32 = arith.constant 0 : i32
    %c0_i32_0 = arith.constant 0 : i32
    %c0_i32_1 = arith.constant 0 : i32
    return %arg0, %c0_i32, %c0_i32_0 : i32, i32, i32
  }
}

</mosaic_0001>

<bundles_post_ra>
// kernel: mpnn2_forward.1
= control target key start
LH: loop header
LB: loop body
LE: loop exit
PB: predicated region body
PF: predicated region fallthrough
CT: control target
= control target key end

     0   :  { %8 = vsyncpa [#allocation4], 0  ;;  %s4895_s0 = inlined_call_operand.vmem [shape: f32[8,8,32], index: 0, kind: input, shape index: {}]   ;;  %s4896_s1 = inlined_call_operand.vmem [shape: f32[2,8,8,8], index: 1, kind: input, shape index: {}]   ;;  %s4897_s2 = inlined_call_operand.vmem [shape: f32[2,88,32], index: 2, kind: input, shape index: {}]   ;;  %s4898_s3 = inlined_call_operand.hbm [shape: f32[8,8,32], index: 3, kind: output, shape index: {}]  }
   0x1   :  { %10 = vsyncpa [#allocation4 + $0x1], 0  ;;  %s4191_s12 = smov 0   ;;  %s4193_s13 = smov 0  }
   0x2   :  { %s4195_s14 = smov 0   ;;  %s4197_s15 = smov 0  }
   0x3 LB: > { %s4212_s16 = sadd.s32 4294967295, %s4164_s15   ;;  %s3470_s17 = sadd.s32 4294967294, %s4164_s15   ;;  %s4164_s15 = sphi %s4197_s15, %s4904_s15   ;;  %s4160_s14 = sphi %s4195_s14, %s4903_s14   ;;  %s4156_s13 = sphi %s4193_s13, %s4902_s13   ;;  %s4152_s12 = sphi %s4191_s12, %s4901_s12  }
   0x4   : > { %s4216_s18 = sadd.s32 1, %s4164_s15   ;;  %s49_s19 = sadd.s32 1, %s4160_s14 }
   0x5   : > { %s46_s20 = ssub.s32 %s4164_s15, %s4216_s18  ;;  %p56_p0 = scmp.ne.s32.totalorder %s4160_s14, %s4156_s13 }
   0x6   : > { %p47_p1 = scmp.eq.s32.totalorder %s46_s20, 0  ;;  %p57_p2 = scmp.eq.s32.totalorder %s4164_s15, 0 }
   0x7   : > { %p107_p3 = scmp.eq.s32.totalorder %s4212_s16, 1  ;;  %p112_p4 = scmp.ne.s32.totalorder %s4156_s13, %s4152_s12 }
   0x8   : > { %s4228_s21 = scalar_select %p47_p1, %s4160_s14, %s49_s19  }
   0x9   : > { %p58_p5 = por %p57_p2, %p56_p0  ;;  %p4230_p6 = por %p107_p3, %p56_p0 }
   0xa   : > { %p113_p7 = scmp.eq.s32.totalorder %s3470_s17, 1  ;;  %p3472_p9 = scmp.ge.s32.totalorder %s4164_s15, 2 }
   0xc   : > { %p4234_p8 = por %p113_p7, %p112_p4  ;;  %132 = sbr.rel (%p3472_p9) target bundleno = 27 (0x1b), region = 20 }
  0x13   : > { %144 = sbr.rel (!%p58_p5) target bundleno = 27 (0x1b), region = 28  ;;  %s146_s24 = sand.u32 (%p58_p5), 1, %s4160_s14  }
  0x14   : > { %s3577_s25 = sshll.u32 (%p58_p5), %s4164_s15, 5  ;;  %s3473_s26 = sshll.u32 (%p58_p5), %s146_s24, 6 }
  0x15   : > { %s151_s29 = scalar_lea.vmem (%p58_p5), %s4896_s1, %s3577_s25  ;;  %s148_s30 = scalar_lea.vmem (%p58_p5), [#allocation2], %s3473_s26 }
  0x16   : > { %v193_v0 = vld [vmem:[%s151_s29] sm:$0xff] (%p58_p5)  ;;  %v195_v1 = vld [vmem:[%s151_s29 + $0x8] sm:$0xff] (%p58_p5)  ;;  %v197_v2 = vld [vmem:[%s151_s29 + $0x10] sm:$0xff] (%p58_p5) }
  0x17   : > { %194 = vst [vmem:[%s148_s30] sm:$0xff] (%p58_p5), %v193_v0  ;;  %196 = vst [vmem:[%s148_s30 + $0x8] sm:$0xff] (%p58_p5), %v195_v1  ;;  %v199_v3 = vld [vmem:[%s151_s29 + $0x18] sm:$0xff] (%p58_p5)  ;;  %v201_v4 = vld [vmem:[%s151_s29 + $0x40] sm:$0xff] (%p58_p5) }
  0x18   : > { %198 = vst [vmem:[%s148_s30 + $0x10] sm:$0xff] (%p58_p5), %v197_v2  ;;  %v203_v5 = vld [vmem:[%s151_s29 + $0x48] sm:$0xff] (%p58_p5)  ;;  %200 = vst [vmem:[%s148_s30 + $0x18] sm:$0xff] (%p58_p5), %v199_v3  ;;  %v205_v6 = vld [vmem:[%s151_s29 + $0x50] sm:$0xff] (%p58_p5) }
  0x19   : > { %202 = vst [vmem:[%s148_s30 + $0x20] sm:$0xff] (%p58_p5), %v201_v4  ;;  %204 = vst [vmem:[%s148_s30 + $0x28] sm:$0xff] (%p58_p5), %v203_v5  ;;  %v207_v7 = vld [vmem:[%s151_s29 + $0x58] sm:$0xff] (%p58_p5) }
  0x1a   : > { %206 = vst [vmem:[%s148_s30 + $0x30] sm:$0xff] %v205_v6  ;;  %208 = vst [vmem:[%s148_s30 + $0x38] sm:$0xff] %v207_v7 }
  0x1b PF: > { %p3476_p10 = scmp.ge.s32.totalorder %s4164_s15, 1  ;;  %p213_p11 = scmp.lt.s32.totalorder %s4164_s15, 3 }
  0x1d   : > { %p214_p12 = pnand %p3476_p10, %p213_p11 }
  0x1e   : > { %v275_v8 = vld [vmem:[%s4897_s2] sm:$0xff] (!%p214_p12)  ;;  %v276_v9 = vld [vmem:[%s4897_s2 + $0x8] sm:$0xff] (!%p214_p12)  ;;  %v277_v10 = vld [vmem:[%s4897_s2 + $0x10] sm:$0xff] (!%p214_p12)  ;;  %s3479_s10 = sshll.u32 (!%p214_p12), %s4212_s16, 2  ;;  %vm286_vm0 = vcmask (!%p214_p12), 261120   ;;  %v4166_v18 = vmov (!%p214_p12), 0.0   ;;  %v269_v19 = vlaneseq (!%p214_p12) }
  0x1f   : > { %217 = sbr.rel (%p214_p12) target bundleno = 2189 (0x88d), region = 66  ;;  %v3835_v11 = vpack.c.bf16 (!%p214_p12), %v276_v9, %v275_v8  ;;  %v278_v12 = vld [vmem:[%s4897_s2 + $0x18] sm:$0xff] (!%p214_p12)  ;;  %p249_p13 = scmp.lt.s32.totalorder (!%p214_p12), %s3479_s10, 7  ;;  %3673 = vmatprep.subr.mxu1 (!%p214_p12), %v4166_v18  ;;  %v285_v24 = vld [vmem:[%s4897_s2 + $0x50] sm:$0x7] (!%p214_p12)  ;;  %vm736_vm8 = vcmask (!%p214_p12), 64512  }
  0x20   : > { %v3839_v13 = vpack.c.bf16 (!%p214_p12), %v278_v12, %v277_v10  ;;  %v4282_v20 = vshrl.u32 (!%p214_p12), %v269_v19, 7  ;;  %v3493_v12 = vld [vmem:[%s4897_s2 + $0x48] ss:$0 sm:$0xff] (!%p214_p12)  ;;  %s4346_s30 = sand.u32 (!%p214_p12), 1, %s4156_s13   ;;  %s3578_s6 = sshll.u32 (!%p214_p12), %s4212_s16, 9 }
  0x21   : > { %3836 = vmatprep.subr.bf16.mxu0 (!%p214_p12), %v3835_v11  ;;  %s3477_s4 = sshll.u32 (!%p214_p12), %s4346_s30, 6  ;;  %s3377_s16 = scalar_lea.sflag (!%p214_p12), [#allocation4], %s4346_s30 }
  0x22   : > { %3838 = vmatpush3.bf16.msra.mxu0 (!%p214_p12), %v3835_v11  ;;  %v386_v21 = vsub.s32 (!%p214_p12), 0, %v4282_v20  ;;  %v446_v22 = vsub.s32 (!%p214_p12), 1, %v4282_v20  ;;  %v502_v23 = vsub.s32 (!%p214_p12), 2, %v4282_v20  ;;  %s4350_s5 = scalar_lea.vmem (!%p214_p12), [#allocation2], %s3477_s4  ;;  %s3478_s4 = sshll.u32 (!%p214_p12), %s4346_s30, 5 }
  0x23   : > { %3840 = vmatprep.subr.bf16.mxu0 (!%p214_p12), %v3839_v13  ;;  %s4168_s17 = smov (!%p214_p12), [#allocation3]  }
  0x24   : > { %v387_v25 = vrot.slane (!%p214_p12), %v285_v24, %v386_v21  ;;  %v447_v26 = vrot.slane (!%p214_p12), %v285_v24, %v446_v22  ;;  %v503_v27 = vrot.slane (!%p214_p12), %v285_v24, %v502_v23 }
  0x26   : > { %s4906_s10 = smov (!%p249_p13, %s3479_s10), 7  ;;  %3842 = vmatpush3.bf16.msra.mxu0 %v3839_v13 }
  0x27   : > { %s3480_s19 = sshll.u32 %s4906_s10, 3  ;;  %s4843_s10 = scalar_lea.hbm %s4898_s3, %s3578_s6 }
  0x28   : > { %s252_s25 = scalar_lea.vmem %s4895_s0, %s3480_s19  ;;  %s4106_s19 = sshll.u32 %s4168_s17, 4  ;;  %s4107_s19 = int_to_ptr.vmem [resolvable:$false] %s4106_s19 }
  0x29   : > { %v4264_v14 = vld [vmem:[%s252_s25] sm:$0xff]  ;;  %v4268_v15 = vld [vmem:[%s252_s25 + $0x8] sm:$0xff]  ;;  %v4270_v16 = vld [vmem:[%s252_s25 + $0x10] sm:$0xff]  ;;  %s4108_s20 = scalar_lea.vmem %s4107_s19, 1024 }
  0x2a   : > { %3667 = vmatprep.mubr.msk.f32.mxu0 %vm286_vm0, %v4264_v14  ;;  %v4276_v17 = vld [vmem:[%s252_s25 + $0x18] sm:$0xff] }
  0x2b   : > { %3668 = vmatmul.mubr.msk.f32.vlgmr.msra.gmra.mrb[0].mxu0 %vm286_vm0, %v4268_v15 }
  0x2c   : > { %3670 = vmatprep.mubr.msk.f32.mxu0 %vm286_vm0, %v4270_v16 }
  0x2f   : > { %3671 = vmatmul.mubr.msk.f32.gmra.mrb[2].mxu0 %vm286_vm0, %v4276_v17 }
  0xfe   : > { %v3669_v28 = vpop.f32.mrb[0].mxu0 }
  0xff   : > { %v389_v29 = vadd.f32 %v3669_v28, %v387_v25  ;;  %v449_v30 = vadd.f32 %v3669_v28, %v447_v26  ;;  %v505_v31 = vadd.f32 %v3669_v28, %v503_v27  ;;  %v365_v32 = vpop.f32.mrb[1].mxu0 }
 0x100   : > { %v388_v33 = vadd.f32 %v387_v25, %v365_v32  ;;  %v448_v34 = vadd.f32 %v447_v26, %v365_v32  ;;  %v504_v35 = vadd.f32 %v503_v27, %v365_v32 }
 0x101   : > { %v3490_v36 = vmul.f32 -1.442695, %v389_v29  ;;  %v3495_v37 = vmul.f32 -1.442695, %v449_v30  ;;  %v3499_v38 = vmul.f32 -1.442695, %v505_v31 }
 0x102   : > { %v3489_v39 = vmul.f32 -1.442695, %v388_v33  ;;  %v3494_v40 = vmul.f32 -1.442695, %v448_v34  ;;  %v3672_v41 = vpop.f32.mrb[2].mxu0 }
 0x103   : > { %3942 = vpow2.f32 %v3490_v36  ;;  %v3498_v42 = vmul.f32 -1.442695, %v504_v35  ;;  %v391_v43 = vadd.f32 %v3672_v41, %v387_v25  ;;  %v451_v44 = vadd.f32 %v3672_v41, %v447_v26  ;;  %v375_v45 = vpop.f32.mrb[3].mxu0 }
 0x104   : > { %3944 = vpow2.f32 %v3495_v37  ;;  %v390_v46 = vadd.f32 %v387_v25, %v375_v45  ;;  %v450_v47 = vadd.f32 %v447_v26, %v375_v45  ;;  %v506_v49 = vadd.f32 %v503_v27, %v375_v45 }
 0x105   : > { %3946 = vpow2.f32 %v3499_v38  ;;  %v3492_v48 = vmul.f32 -1.442695, %v391_v43  ;;  %v3497_v50 = vmul.f32 -1.442695, %v451_v44  ;;  %v507_v51 = vadd.f32 %v3672_v41, %v503_v27 }
 0x106   : > { %3948 = vpow2.f32 %v3489_v39  ;;  %v3491_v52 = vmul.f32 -1.442695, %v390_v46  ;;  %v3496_v53 = vmul.f32 -1.442695, %v450_v47  ;;  %v3500_v54 = vmul.f32 -1.442695, %v506_v49 }
 0x107   : > { %3950 = vpow2.f32 %v3494_v40  ;;  %v3501_v55 = vmul.f32 -1.442695, %v507_v51 }
 0x108   : > { %3952 = vpow2.f32 %v3498_v42 }
 0x109   : > { %3954 = vpow2.f32 %v3492_v48 }
 0x10a   : > { %3956 = vpow2.f32 %v3497_v50 }
 0x10b   : > { %3958 = vpow2.f32 %v3491_v52 }
 0x10c   : > { %3960 = vpow2.f32 %v3496_v53 }
 0x10d   : > { %v3943_v56 = vpop.eup %3942  ;;  %3962 = vpow2.f32 %v3500_v54 }
 0x10e   : > { %v3945_v57 = vpop.eup %3944  ;;  %v405_v58 = vadd.f32 1.0, %v3943_v56  ;;  %3964 = vpow2.f32 %v3501_v55 }
 0x10f   : > { %v3947_v59 = vpop.eup %3946  ;;  %v465_v60 = vadd.f32 1.0, %v3945_v57 }
 0x110   : > { %v3949_v61 = vpop.eup %3948  ;;  %3966 = vrcp.f32 %v405_v58  ;;  %v521_v62 = vadd.f32 1.0, %v3947_v59 }
 0x111   : > { %v3951_v63 = vpop.eup %3950  ;;  %3968 = vrcp.f32 %v465_v60  ;;  %v404_v0 = vadd.f32 1.0, %v3949_v61 }
 0x112   : > { %v3953_v1 = vpop.eup %3952  ;;  %3970 = vrcp.f32 %v521_v62  ;;  %v464_v2 = vadd.f32 1.0, %v3951_v63  ;;  %v561_v63 = vand.u32 127, %v269_v19 }
 0x113   : > { %3972 = vrcp.f32 %v404_v0  ;;  %v520_v3 = vadd.f32 1.0, %v3953_v1  ;;  %v3955_v4 = vpop.eup %3954  ;;  %v3482_v0 = vld [vmem:[%s4350_s5 + $0x28] sm:$0xff] }
 0x114   : > { %3974 = vrcp.f32 %v464_v2  ;;  %v3957_v5 = vpop.eup %3956  ;;  %v407_v10 = vadd.f32 1.0, %v3955_v4  ;;  %v4354_v1 = vsub.s32 %v561_v63, %v4282_v20  ;;  %v4357_v2 = vld [vmem:[%s4350_s5 + $0x8] sm:$0xff]  ;;  %vm437_vm1 = vcmp.eq.f32.partialorder %v3482_v0, 0.0 }
 0x115   : > { %3976 = vrcp.f32 %v520_v3  ;;  %v3959_v6 = vpop.eup %3958  ;;  %v467_v32 = vadd.f32 1.0, %v3957_v5  ;;  %vm493_vm2 = vcmp.eq.f32.partialorder %v3482_v0, 1.0  ;;  %v4360_v4 = vsel %vm437_vm1, %v4357_v2, 0.0 }
 0x116   : > { %v3961_v7 = vpop.eup %3960  ;;  %v406_v8 = vadd.f32 1.0, %v3959_v6  ;;  %v4363_v19 = vsel %vm493_vm2, %v4357_v2, 0.0  ;;  %vm549_vm3 = vcmp.eq.f32.partialorder %v3482_v0, 2.0  ;;  %vm729_vm7 = vcmp.gt.f32.partialorder %v4357_v2, 0.0 }
 0x117   : > { %v3963_v9 = vpop.eup %3962  ;;  %v466_v11 = vadd.f32 1.0, %v3961_v7 }
 0x118   : > { %v3965_v13 = vpop.eup %3964  ;;  %3978 = vrcp.f32 %v406_v8  ;;  %v522_v24 = vadd.f32 1.0, %v3963_v9  ;;  %v3481_v9 = vld [vmem:[%s4350_s5 + $0x20] sm:$0xff] }
 0x119   : > { %3980 = vrcp.f32 %v466_v11  ;;  %v523_v29 = vadd.f32 1.0, %v3965_v13  ;;  %vm436_vm4 = vcmp.eq.f32.partialorder %v3481_v9, 0.0  ;;  %vm492_vm5 = vcmp.eq.f32.partialorder %v3481_v9, 1.0 }
 0x11a   : > { %v4299_v25 = vpop.eup %3966  ;;  %3982 = vrcp.f32 %v407_v10  ;;  %vm548_vm6 = vcmp.eq.f32.partialorder %v3481_v9, 2.0 }
 0x11b   : > { %v4301_v26 = vpop.eup %3968  ;;  %v421_v27 = vmul.f32 %v4299_v25, %v3493_v12  ;;  %3984 = vrcp.f32 %v522_v24 }
 0x11c   : > { %v4304_v28 = vpop.eup %3970  ;;  %v477_v30 = vmul.f32 %v4301_v26, %v3493_v12  ;;  %3986 = vrcp.f32 %v523_v29 }
 0x11d   : > { %v4307_v31 = vpop.eup %3972  ;;  %v427_v33 = vsel %vm286_vm0, %v421_v27, 0.0  ;;  %v533_v34 = vmul.f32 %v4304_v28, %v3493_v12  ;;  %3988 = vrcp.f32 %v467_v32  ;;  %v4375_v27 = vld [vmem:[%s4350_s5] sm:$0xff]  ;;  %v3483_v32 = vld [vmem:[%s4350_s5 + $0x30] sm:$0xff] }
 0x11e   : > { %v3975_v35 = vpop.eup %3974  ;;  %v483_v36 = vsel %vm286_vm0, %v477_v30, 0.0  ;;  %428 = vadd.xlane.f32.xlu1 %v427_v33  ;;  %v420_v37 = vmul.f32 %v4307_v31, %v3493_v12  ;;  %vm494_vm9 = vcmp.eq.f32.partialorder %v3483_v32, 1.0  ;;  %vm438_vm10 = vcmp.eq.f32.partialorder %v3483_v32, 0.0 }
 0x11f   : > { %v4313_v38 = vpop.eup %3976  ;;  %3674 = vmatpush3.msra.mxu1 %v3975_v35  ;;  %484 = vadd.xlane.f32.xlu0 %v483_v36  ;;  %v539_v39 = vsel %vm286_vm0, %v533_v34, 0.0  ;;  %v476_v42 = vmul.f32 %v3975_v35, %v3493_v12  ;;  %v4382_v35 = vsel %vm436_vm4, %v4375_v27, 0.0  ;;  %vm550_vm11 = vcmp.eq.f32.partialorder %v3483_v32, 2.0 }
 0x120   : > { %3678 = vmatprep.subr.mxu1 %v4166_v18  ;;  %v532_v40 = vmul.f32 %v4313_v38, %v3493_v12  ;;  %v424_v41 = vsel %vm286_vm0, %v420_v37, 0.0  ;;  %v4385_v37 = vsel %vm492_vm5, %v4375_v27, 0.0  ;;  %vm728_vm12 = vcmp.gt.f32.partialorder %v4375_v27, 0.0 }
 0x121   : > { %v480_v49 = vsel %vm286_vm0, %v476_v42, 0.0  ;;  %v4390_v42 = vld [vmem:[%s4350_s5 + $0x10] sm:$0xff]  ;;  %vm271_vm4 = vcmp.lt.s32.totalorder %v4282_v20, 4 }
 0x122   : > { %540 = vadd.xlane.f32.xlu1 %v539_v39  ;;  %v4319_v43 = vpop.eup %3978  ;;  %v536_v46 = vsel %vm286_vm0, %v532_v40, 0.0  ;;  %vm730_vm1 = vcmp.gt.f32.partialorder %v4390_v42, 0.0 }
 0x123   : > { %425 = vadd.xlane.f32.xlu0 %v424_v41  ;;  %v4321_v44 = vpop.eup %3980  ;;  %v422_v45 = vmul.f32 %v4319_v43, %v3493_v12 }
 0x124   : > { %v478_v47 = vmul.f32 %v4321_v44, %v3493_v12  ;;  %v4326_v48 = vpop.eup %3982 }
 0x125   : > { %v4329_v50 = vpop.eup %3984  ;;  %v430_v52 = vsel %vm286_vm0, %v422_v45, 0.0  ;;  %v423_v53 = vmul.f32 %v4326_v48, %v3493_v12  ;;  %v4393_v45 = vsel %vm548_vm6, %v4375_v27, 0.0 }
 0x126   : > { %537 = vadd.xlane.f32.xlu1 %v536_v46  ;;  %v486_v51 = vsel %vm286_vm0, %v478_v47, 0.0  ;;  %v4334_v54 = vpop.eup %3986  ;;  %v534_v55 = vmul.f32 %v4329_v50, %v3493_v12 }
 0x127   : > { %481 = vadd.xlane.f32.xlu0 %v480_v49  ;;  %v4337_v56 = vpop.eup %3988  ;;  %v433_v57 = vsel %vm286_vm0, %v423_v53, 0.0  ;;  %v535_v58 = vmul.f32 %v4334_v54, %v3493_v12  ;;  %v4401_v53 = vsel %vm494_vm9, %v4390_v42, 0.0 }
 0x128   : > { %v542_v59 = vsel %vm286_vm0, %v534_v55, 0.0  ;;  %v479_v60 = vmul.f32 %v4337_v56, %v3493_v12  ;;  %v4371_v12 = vsel %vm549_vm3, %v4357_v2, 0.0  ;;  %vm4167_vm3 = vmmov 0  }
 0x129   : > { %v545_v61 = vsel %vm286_vm0, %v535_v58, 0.0  ;;  %v4405_v58 = vsel %vm438_vm10, %v4390_v42, 0.0  ;;  %3675 = vmatprep.mubr.msk.f32.mxu1 %vm4167_vm3, %v4166_v18 }
 0x12a   : > { %487 = vadd.xlane.f32.xlu1 %v486_v51  ;;  %v489_v62 = vsel %vm286_vm0, %v479_v60, 0.0 }
 0x12b   : > { %431 = vadd.xlane.f32.xlu0 %v430_v52 }
 0x12e   : > { %434 = vadd.xlane.f32.xlu1 %v433_v57 }
 0x12f   : > { %543 = vadd.xlane.f32.xlu0 %v542_v59 }
 0x132   : > { %546 = vadd.xlane.f32.xlu1 %v545_v61 }
 0x133   : > { %490 = vadd.xlane.f32.xlu0 %v489_v62  ;;  %v3484_v62 = vld [vmem:[%s4350_s5 + $0x38] sm:$0xff] }
 0x134   : > { %vm439_vm13 = vcmp.eq.f32.partialorder %v3484_v62, 0.0  ;;  %vm495_vm14 = vcmp.eq.f32.partialorder %v3484_v62, 1.0  ;;  %vm551_vm15 = vcmp.eq.f32.partialorder %v3484_v62, 2.0 }
 0x1ab   : > { %v429_v3 = vpop.xlane.xlu1 %428 }
 0x1ac   : > { %v485_v5 = vpop.xlane.xlu0 %484  ;;  %v569_v6 = vrot.slane %v429_v3, %v4354_v1 }
 0x1ad   : > { %v627_v7 = vrot.slane %v485_v5, %v4354_v1 }
 0x1ae   : > { %v613_v8 = vmul.f32 %v569_v6, %v4360_v4 }
 0x1af   : > { %v665_v10 = vmul.f32 %v627_v7, %v4363_v19  ;;  %v541_v11 = vpop.xlane.xlu1 %540  ;;  %v4414_v7 = vsel %vm550_vm11, %v4390_v42, 0.0 }
 0x1b0   : > { %v683_v13 = vrot.slane %v541_v11, %v4354_v1  ;;  %v426_v24 = vpop.xlane.xlu0 %425 }
 0x1b1   : > { %v669_v29 = vadd.f32 %v665_v10, %v613_v8  ;;  %v565_v33 = vrot.slane %v426_v24, %v4354_v1  ;;  %v4417_v8 = vld [vmem:[%s4350_s5 + $0x18] sm:$0xff]  ;;  %s247_s5 = scalar_lea.vmem [#allocation3], %s3478_s4 }
 0x1b2   : > { %v721_v30 = vmul.f32 %v683_v13, %v4371_v12  ;;  %v4426_v32 = vsel %vm439_vm13, %v4417_v8, 0.0  ;;  %vm731_vm2 = vcmp.gt.f32.partialorder %v4417_v8, 0.0  ;;  %s3390_s7 = sshll.u32 %s247_s5, 4  ;;  %s4845_s7 = int_to_ptr.vmem [resolvable:$true] %s3390_s7 }
 0x1b3   : > { %v538_v34 = vpop.xlane.xlu1 %537  ;;  %v612_v47 = vmul.f32 %v565_v33, %v4382_v35  ;;  %s4102_s11 = scalar_lea.vmem %s4845_s7, 512  ;;  %p4109_p3 = scmp.lt.s32.totalorder %s4845_s7, %s4107_s19 }
 0x1b4   : > { %v482_v36 = vpop.xlane.xlu0 %481  ;;  %v725_v39 = vadd.f32 %v721_v30, %v669_v29  ;;  %v679_v40 = vrot.slane %v538_v34, %v4354_v1  ;;  %v4429_v34 = vsel %vm495_vm14, %v4417_v8, 0.0  ;;  %p4103_p0 = scmp.ne.s32.totalorder %s4845_s7, %s4102_s11  ;;  %p4110_p4 = scmp.lt.s32.totalorder %s4108_s20, %s4102_s11 }
 0x1b5   : > { %v623_v41 = vrot.slane %v482_v36, %v4354_v1 }
 0x1b6   : > { %v733_v46 = vsel %vm729_vm7, %v725_v39, -1e+30  ;;  %v720_v59 = vmul.f32 %v679_v40, %v4393_v45  ;;  %p4104_p1 = pnand %p4103_p0, %p4230_p6  ;;  %p4111_p5 = por %p4110_p4, %p4109_p3 }
 0x1b7   : > { %v664_v49 = vmul.f32 %v623_v41, %v4385_v37  ;;  %v488_v51 = vpop.xlane.xlu1 %487  ;;  %v740_v52 = vsel %vm736_vm8, %v733_v46, -inf  ;;  %v4435_v41 = vsel %vm551_vm15, %v4417_v8, 0.0 }
 0x1b8   : > { %v631_v55 = vrot.slane %v488_v51, %v4354_v1  ;;  %v432_v57 = vpop.xlane.xlu0 %431  ;;  %741 = vmax.xlane.f32.xlu1 %v740_v52  ;;  %p4105_p2 = pneg %p4104_p1 }
 0x1b9   : > { %v668_v60 = vadd.f32 %v664_v49, %v612_v47  ;;  %v573_v61 = vrot.slane %v432_v57, %v4354_v1 }
 0x1ba   : > { %v666_v63 = vmul.f32 %v631_v55, %v4401_v53  ;;  %p4112_p7 = pnand %p4111_p5, %p4105_p2 }
 0x1bb   : > { %v614_v0 = vmul.f32 %v573_v61, %v4405_v58  ;;  %v435_v3 = vpop.xlane.xlu1 %434  ;;  %v724_v5 = vadd.f32 %v720_v59, %v668_v60 }
 0x1bc   : > { %v544_v6 = vpop.xlane.xlu0 %543  ;;  %v577_v24 = vrot.slane %v435_v3, %v4354_v1 }
 0x1bd   : > { %v687_v9 = vrot.slane %v544_v6, %v4354_v1  ;;  %v732_v10 = vsel %vm728_vm12, %v724_v5, -1e+30  ;;  %v670_v13 = vadd.f32 %v666_v63, %v614_v0 }
 0x1be   : > { %v737_v11 = vsel %vm736_vm8, %v732_v10, -inf  ;;  %v615_v47 = vmul.f32 %v577_v24, %v4426_v32 }
 0x1bf   : > { %v722_v29 = vmul.f32 %v687_v9, %v4414_v7  ;;  %738 = vmax.xlane.f32.xlu0 %v737_v11  ;;  %v547_v30 = vpop.xlane.xlu1 %546 }
 0x1c0   : > { %v491_v33 = vpop.xlane.xlu0 %490  ;;  %v691_v36 = vrot.slane %v547_v30, %v4354_v1 }
 0x1c1   : > { %v635_v39 = vrot.slane %v491_v33, %v4354_v1  ;;  %v726_v40 = vadd.f32 %v722_v29, %v670_v13 }
 0x1c2   : > { %v723_v55 = vmul.f32 %v691_v36, %v4435_v41 }
 0x1c3   : > { %v667_v49 = vmul.f32 %v635_v39, %v4429_v34  ;;  %v734_v51 = vsel %vm730_vm1, %v726_v40, -1e+30 }
 0x1c4   : > { %v743_v52 = vsel %vm736_vm8, %v734_v51, -inf }
 0x1c5   : > { %v671_v57 = vadd.f32 %v667_v49, %v615_v47  ;;  %744 = vmax.xlane.f32.xlu0 %v743_v52 }
 0x1c7   : > { %v727_v59 = vadd.f32 %v723_v55, %v671_v57 }
 0x1c9   : > { %v735_v60 = vsel %vm731_vm2, %v727_v59, -1e+30 }
 0x1ca   : > { %v746_v61 = vsel %vm736_vm8, %v735_v60, -inf }
 0x1cb   : > { %747 = vmax.xlane.f32.xlu1 %v746_v61 }
 0x245   : > { %v742_v62 = vpop.xlane.xlu1 %741 }
 0x246   : > { %v750_v63 = vsub.f32 %v733_v46, %v742_v62  ;;  %v280_v62 = vld [vmem:[%s4897_s2 + $0x28] sm:$0xff] }
 0x248   : > { %v755_v0 = vmul.f32 1.442695, %v750_v63 }
 0x24a   : > { %3990 = vpow2.f32 %v755_v0  ;;  %v282_v0 = vld [vmem:[%s4897_s2 + $0x38] sm:$0xff] }
 0x24c   : > { %v739_v3 = vpop.xlane.xlu0 %738 }
 0x24d   : > { %v749_v5 = vsub.f32 %v732_v10, %v739_v3 }
 0x24f   : > { %v753_v6 = vmul.f32 1.442695, %v749_v5 }
 0x251   : > { %3992 = vpow2.f32 %v753_v6 }
 0x252   : > { %v745_v9 = vpop.xlane.xlu0 %744 }
 0x253   : > { %v751_v11 = vsub.f32 %v734_v51, %v745_v9 }
 0x254   : > { %v3991_v13 = vpop.eup %3990 }
 0x255   : > { %v757_v24 = vmul.f32 1.442695, %v751_v11  ;;  %v4450_v29 = vmul.f32 %v3991_v13, %v4357_v2 }
 0x257   : > { %3994 = vpow2.f32 %v757_v24  ;;  %v768_v30 = vsel %vm736_vm8, %v4450_v29, 0.0  ;;  %v782_v51 = vmul.f32 %v4450_v29, %v4363_v19  ;;  %v778_v61 = vmul.f32 %v4450_v29, %v4360_v4 }
 0x258   : > { %v748_v33 = vpop.xlane.xlu1 %747  ;;  %769 = vadd.xlane.f32.xlu1 %v768_v30 }
 0x259   : > { %v752_v46 = vsub.f32 %v735_v60, %v748_v33  ;;  %v1685_v33 = vmul.f32 0.5, %v4264_v14 }
 0x25b   : > { %v3993_v36 = vpop.eup %3992  ;;  %v759_v39 = vmul.f32 1.442695, %v752_v46 }
 0x25c   : > { %v761_v10 = vmul.f32 %v3993_v36, %v4375_v27 }
 0x25d   : > { %3996 = vpow2.f32 %v759_v39 }
 0x25e   : > { %v765_v40 = vsel %vm736_vm8, %v761_v10, 0.0  ;;  %v781_v47 = vmul.f32 %v761_v10, %v4385_v37 }
 0x25f   : > { %766 = vadd.xlane.f32.xlu0 %v765_v40 }
 0x260   : > { %3676 = vmatmul.mubr.msk.f32.vlgmr.msra.gmra.mrb[0].mxu1 %vm736_vm8, %v781_v47  ;;  %v1686_v47 = vmul.f32 0.5, %v4268_v15 }
 0x261   : > { %v3995_v49 = vpop.eup %3994  ;;  %3679 = vmatpush3.msra.mxu1 %v4301_v26  ;;  %3680 = vmatprep.mubr.msk.f32.mxu1 %vm4167_vm3, %v4166_v18 }
 0x262   : > { %3683 = vmatprep.subr.mxu1 %v4166_v18  ;;  %v763_v52 = vmul.f32 %v3995_v49, %v4390_v42 }
 0x264   : > { %3681 = vmatmul.mubr.msk.f32.vlgmr.msra.gmra.mrb[2].mxu1 %vm736_vm8, %v782_v51  ;;  %v771_v55 = vsel %vm736_vm8, %v763_v52, 0.0  ;;  %v783_v26 = vmul.f32 %v763_v52, %v4401_v53 }
 0x265   : > { %3684 = vmatpush3.msra.mxu1 %v4321_v44  ;;  %772 = vadd.xlane.f32.xlu0 %v771_v55 }
 0x266   : > { %3685 = vmatprep.mubr.msk.f32.mxu1 %vm4167_vm3, %v4166_v18  ;;  %3688 = vmatprep.subr.mxu1 %v4166_v18 }
 0x267   : > { %v3997_v57 = vpop.eup %3996 }
 0x268   : > { %3686 = vmatmul.mubr.msk.f32.vlgmr.msra.gmra.mrb[4].mxu1 %vm736_vm8, %v783_v26  ;;  %v764_v59 = vmul.f32 %v3997_v57, %v4417_v8  ;;  %v1687_v57 = vmul.f32 0.5, %v4270_v16 }
 0x269   : > { %3689 = vmatpush3.msra.mxu1 %v4337_v56  ;;  %3690 = vmatprep.mubr.msk.f32.mxu1 %vm4167_vm3, %v4166_v18  ;;  %v777_v56 = vmul.f32 %v761_v10, %v4382_v35 }
 0x26a   : > { %v774_v44 = vsel %vm736_vm8, %v764_v59, 0.0  ;;  %3693 = vmatprep.subr.mxu1 %v4166_v18  ;;  %v784_v60 = vmul.f32 %v764_v59, %v4429_v34 }
 0x26b   : > { %775 = vadd.xlane.f32.xlu1 %v774_v44 }
 0x26c   : > { %3691 = vmatmul.mubr.msk.f32.vlgmr.msra.gmra.mrb[6].mxu1 %vm736_vm8, %v784_v60 }
 0x26d   : > { %3694 = vmatpush3.msra.mxu1 %v4307_v31  ;;  %3695 = vmatprep.mubr.msk.f32.mxu1 %vm4167_vm3, %v4166_v18  ;;  %v779_v31 = vmul.f32 %v763_v52, %v4405_v58 }
 0x26e   : > { %3698 = vmatprep.subr.mxu1 %v4166_v18 }
 0x270   : > { %3696 = vmatmul.mubr.msk.f32.vlgmr.msra.gmra.mrb[0].mxu1 %vm736_vm8, %v777_v56 }
 0x271   : > { %3699 = vmatpush3.msra.mxu1 %v4299_v25  ;;  %3700 = vmatprep.mubr.msk.f32.mxu1 %vm4167_vm3, %v4166_v18  ;;  %v780_v25 = vmul.f32 %v764_v59, %v4426_v32 }
 0x272   : > { %3703 = vmatprep.subr.mxu1 %v4166_v18 }
 0x274   : > { %3701 = vmatmul.mubr.msk.f32.vlgmr.msra.gmra.mrb[2].mxu1 %vm736_vm8, %v778_v61 }
 0x275   : > { %3704 = vmatpush3.msra.mxu1 %v4319_v43  ;;  %3705 = vmatprep.mubr.msk.f32.mxu1 %vm4167_vm3, %v4166_v18  ;;  %v1369_v43 = vmul.f32 %v761_v10, %v4393_v45 }
 0x276   : > { %3708 = vmatprep.subr.mxu1 %v4166_v18 }
 0x278   : > { %3706 = vmatmul.mubr.msk.f32.vlgmr.msra.gmra.mrb[4].mxu1 %vm736_vm8, %v779_v31  ;;  %v1688_v31 = vmul.f32 0.5, %v4276_v17 }
 0x279   : > { %3709 = vmatpush3.msra.mxu1 %v4326_v48  ;;  %3710 = vmatprep.mubr.msk.f32.mxu1 %vm4167_vm3, %v4166_v18  ;;  %v1370_v48 = vmul.f32 %v4450_v29, %v4371_v12 }
 0x27a   : > { %3713 = vmatprep.subr.mxu1 %v4166_v18 }
 0x27c   : > { %3711 = vmatmul.mubr.msk.f32.vlgmr.msra.gmra.mrb[6].mxu1 %vm736_vm8, %v780_v25 }
 0x27d   : > { %3714 = vmatpush3.msra.mxu1 %v4313_v38  ;;  %3715 = vmatprep.mubr.msk.f32.mxu1 %vm4167_vm3, %v4166_v18  ;;  %v1371_v38 = vmul.f32 %v763_v52, %v4414_v7 }
 0x27e   : > { %3718 = vmatprep.subr.mxu1 %v4166_v18 }
 0x280   : > { %3716 = vmatmul.mubr.msk.f32.vlgmr.msra.gmra.mrb[0].mxu1 %vm736_vm8, %v1369_v43 }
 0x281   : > { %3719 = vmatpush3.msra.mxu1 %v4304_v28  ;;  %3720 = vmatprep.mubr.msk.f32.mxu1 %vm4167_vm3, %v4166_v18  ;;  %v1372_v28 = vmul.f32 %v764_v59, %v4435_v41 }
 0x282   : > { %3723 = vmatprep.subr.mxu1 %v4166_v18 }
 0x284   : > { %3721 = vmatmul.mubr.msk.f32.vlgmr.msra.gmra.mrb[2].mxu1 %vm736_vm8, %v1370_v48 }
 0x285   : > { %3724 = vmatpush3.msra.mxu1 %v4329_v50  ;;  %3725 = vmatprep.mubr.msk.f32.mxu1 %vm4167_vm3, %v4166_v18  ;;  %v279_v50 = vld [vmem:[%s4897_s2 + $0x20] sm:$0xff] }
 0x286   : > { %3728 = vmatprep.subr.mxu1 %v4166_v18  ;;  %v3843_v63 = vpack.c.bf16 %v280_v62, %v279_v50  ;;  %v3523_v50 = vld [vmem:[%s4897_s2 + $0x58] sm:$0xff]  ;;  %v3524_v62 = vld [vmem:[%s4897_s2 + $0x60] sm:$0xff] }
 0x288   : > { %3726 = vmatmul.mubr.msk.f32.vlgmr.msra.gmra.mrb[4].mxu1 %vm736_vm8, %v1371_v38 }
 0x289   : > { %3729 = vmatpush3.msra.mxu1 %v4334_v54  ;;  %3730 = vmatprep.mubr.msk.f32.mxu1 %vm4167_vm3, %v4166_v18  ;;  %v281_v54 = vld [vmem:[%s4897_s2 + $0x30] sm:$0xff] }
 0x28a   : > { %3844 = vmatprep.subr.bf16.mxu1 %v3843_v63  ;;  %v3847_v3 = vpack.c.bf16 %v282_v0, %v281_v54  ;;  %v3525_v54 = vld [vmem:[%s4897_s2 + $0x68] sm:$0xff]  ;;  %v3526_v0 = vld [vmem:[%s4897_s2 + $0x70] sm:$0xff] }
 0x28c   : > { %3731 = vmatmul.mubr.msk.f32.vlgmr.msra.gmra.mrb[6].mxu1 %vm736_vm8, %v1372_v28 }
 0x28d   : > { %3846 = vmatpush3.bf16.msra.mxu1 %v3843_v63  ;;  %v3851_v63 = vpack.c.bf16 %v3524_v62, %v3523_v50 }
 0x28e   : > { %3848 = vmatprep.subr.bf16.mxu1 %v3847_v3 }
 0x28f   : > { %3852 = vmatprep.subr.bf16.mxu0 %v3851_v63 }
 0x290   : > { %3854 = vmatpush3.bf16.msra.mxu0 %v3851_v63 }
 0x291   : > { %3850 = vmatpush3.bf16.msra.mxu1 %v3847_v3  ;;  %v3855_v3 = vpack.c.bf16 %v3526_v0, %v3525_v54 }
 0x293   : > { %3856 = vmatprep.subr.bf16.mxu0 %v3855_v3 }
 0x294   : > { %3858 = vmatpush3.bf16.msra.mxu0 %v3855_v3 }
 0x295   : > { %3761 = vmatprep.subr.mxu0 %v4166_v18 }
 0x2e5   : > { %v4545_v9 = vpop.xlane.xlu1 %769 }
 0x2e6   : > { %v1670_v11 = vmax.f32 %v4545_v9, 1e-30  ;;  %vm1819_vm5 = vcmp.gt.f32.partialorder %v4545_v9, 0.5 }
 0x2e7   : > { %vm1825_vm9 = vmand %vm1819_vm5, %vm271_vm4 }
 0x2ec   : > { %v4542_v5 = vpop.xlane.xlu0 %766 }
 0x2ed   : > { %v1669_v6 = vmax.f32 %v4542_v5, 1e-30  ;;  %vm1818_vm6 = vcmp.gt.f32.partialorder %v4542_v5, 0.5 }
 0x2ee   : > { %vm1824_vm10 = vmand %vm1818_vm6, %vm271_vm4 }
 0x2ef   : > { %3998 = vrcp.f32 %v1669_v6  ;;  %v3514_v6 = vld [vmem:[%s4897_s2 + $0x40] ss:$0 sm:$0xff] }
 0x2f0   : > { %4000 = vrcp.f32 %v1670_v11 }
 0x2f2   : > { %v4548_v13 = vpop.xlane.xlu0 %772 }
 0x2f3   : > { %v1671_v24 = vmax.f32 %v4548_v13, 1e-30  ;;  %vm1820_vm11 = vcmp.gt.f32.partialorder %v4548_v13, 0.5  ;;  %v3533_v13 = vld [vmem:[%s4897_s2 + $0xa8] sm:$0x7] }
 0x2f4   : > { %vm1826_vm14 = vmand %vm1820_vm11, %vm271_vm4 }
 0x2f5   : > { %4002 = vrcp.f32 %v1671_v24 }
 0x2f8   : > { %v4551_v29 = vpop.xlane.xlu1 %775 }
 0x2f9   : > { %v1672_v30 = vmax.f32 %v4551_v29, 1e-30  ;;  %v3999_v46 = vpop.eup %3998  ;;  %vm1821_vm13 = vcmp.gt.f32.partialorder %v4551_v29, 0.5  ;;  %v2004_v29 = vrot.slane %v3533_v13, %v446_v22 }
 0x2fa   : > { %v4001_v49 = vpop.eup %4000  ;;  %vm1827_vm15 = vmand %vm1821_vm13, %vm271_vm4 }
 0x2fb   : > { %4004 = vrcp.f32 %v1672_v30 }
 0x2ff   : > { %v4003_v59 = vpop.eup %4002 }
 0x305   : > { %v4005_v25 = vpop.eup %4004 }
 0x353   : > { %v1442_v36 = vpop.f32.mrb[0].mxu1 }
 0x354   : > { %v1681_v39 = vmul.f32 %v3999_v46, %v1442_v36  ;;  %v3717_v10 = vpop.f32.mrb[1].mxu1 }
 0x356   : > { %v1689_v40 = vadd.f32 %v1685_v33, %v1681_v39 }
 0x357   : > { %v1515_v51 = vpop.f32.mrb[2].mxu1 }
 0x358   : > { %v1682_v52 = vmul.f32 %v4001_v49, %v1515_v51  ;;  %v3722_v55 = vpop.f32.mrb[3].mxu1  ;;  %3741 = vmatprep.mubr.msk.f32.mxu1 %vm286_vm0, %v1689_v40 }
 0x35a   : > { %v1690_v26 = vadd.f32 %v1686_v47, %v1682_v52 }
 0x35b   : > { %v1588_v44 = vpop.f32.mrb[4].mxu1 }
 0x35c   : > { %v1683_v60 = vmul.f32 %v4003_v59, %v1588_v44  ;;  %v3727_v56 = vpop.f32.mrb[5].mxu1  ;;  %3742 = vmatmul.mubr.msk.f32.vlgmr.msra.gmra.mrb[8].mxu1 %vm286_vm0, %v1690_v26 }
 0x35e   : > { %v1691_v61 = vadd.f32 %v1687_v57, %v1683_v60 }
 0x35f   : > { %v1661_v43 = vpop.f32.mrb[6].mxu1 }
 0x360   : > { %v1684_v48 = vmul.f32 %v4005_v25, %v1661_v43  ;;  %v3732_v38 = vpop.f32.mrb[7].mxu1  ;;  %3744 = vmatprep.mubr.msk.f32.mxu1 %vm286_vm0, %v1691_v61 }
 0x362   : > { %v1692_v28 = vadd.f32 %v1688_v31, %v1684_v48 }
 0x364   : > { %3745 = vmatmul.mubr.msk.f32.gmra.mrb[10].mxu1 %vm286_vm0, %v1692_v28 }
 0x42f   : > { %v3743_v11 = vpop.f32.mrb[8].mxu1 }
 0x430   : > { %v1781_v24 = vadd.f32 %v3743_v11, %v3514_v6  ;;  %v1775_v30 = vpop.f32.mrb[9].mxu1 }
 0x431   : > { %v1776_v33 = vadd.f32 %v3514_v6, %v1775_v30 }
 0x432   : > { %v3520_v46 = vmul.f32 -1.442695, %v1781_v24 }
 0x433   : > { %v3519_v36 = vmul.f32 -1.442695, %v1776_v33 }
 0x434   : > { %4006 = vpow2.f32 %v3520_v46 }
 0x435   : > { %4008 = vpow2.f32 %v3519_v36 }
 0x437   : > { %v3746_v39 = vpop.f32.mrb[10].mxu1 }
 0x438   : > { %v1791_v10 = vadd.f32 %v3746_v39, %v3514_v6  ;;  %v1785_v40 = vpop.f32.mrb[11].mxu1 }
 0x439   : > { %v1786_v47 = vadd.f32 %v3514_v6, %v1785_v40 }
 0x43a   : > { %v3522_v49 = vmul.f32 -1.442695, %v1791_v10 }
 0x43b   : > { %v3521_v51 = vmul.f32 -1.442695, %v1786_v47 }
 0x43c   : > { %4010 = vpow2.f32 %v3522_v49 }
 0x43d   : > { %4012 = vpow2.f32 %v3521_v51 }
 0x43e   : > { %v4007_v52 = vpop.eup %4006 }
 0x43f   : > { %v4009_v55 = vpop.eup %4008  ;;  %v1807_v26 = vadd.f32 1.0, %v4007_v52 }
 0x440   : > { %v1806_v57 = vadd.f32 1.0, %v4009_v55 }
 0x441   : > { %4014 = vrcp.f32 %v1807_v26 }
 0x442   : > { %4016 = vrcp.f32 %v1806_v57 }
 0x446   : > { %v4011_v59 = vpop.eup %4010 }
 0x447   : > { %v4013_v44 = vpop.eup %4012  ;;  %v1809_v60 = vadd.f32 1.0, %v4011_v59 }
 0x448   : > { %v1808_v56 = vadd.f32 1.0, %v4013_v44 }
 0x449   : > { %4018 = vrcp.f32 %v1809_v60 }
 0x44a   : > { %4020 = vrcp.f32 %v1808_v56 }
 0x44b   : > { %v4015_v61 = vpop.eup %4014 }
 0x44c   : > { %v4017_v31 = vpop.eup %4016  ;;  %v4586_v25 = vsel %vm1825_vm9, %v4015_v61, %v4268_v15 }
 0x44d   : > { %v4589_v43 = vsel %vm1824_vm10, %v4017_v31, %v4264_v14 }
 0x44e   : > { %3755 = vmatprep.mubr.msk.f32.mxu0 %vm286_vm0, %v4589_v43 }
 0x44f   : > { %3756 = vmatmul.mubr.msk.f32.vlgmr.msra.gmra.mrb[4].mxu0 %vm286_vm0, %v4586_v25 }
 0x453   : > { %v4019_v5 = vpop.eup %4018 }
 0x454   : > { %v4021_v9 = vpop.eup %4020  ;;  %v4607_v15 = vsel %vm1827_vm15, %v4019_v5, %v4276_v17  ;;  %v2052_v17 = vrot.slane %v3533_v13, %v502_v23 }
 0x455   : > { %v4602_v14 = vsel %vm1826_vm14, %v4021_v9, %v4270_v16  ;;  %v1952_v16 = vrot.slane %v3533_v13, %v386_v21 }
 0x456   : > { %3758 = vmatprep.mubr.msk.f32.mxu0 %vm286_vm0, %v4602_v14 }
 0x457   : > { %3759 = vmatmul.mubr.msk.f32.gmra.mrb[6].mxu0 %vm286_vm0, %v4607_v15 }
 0x458   : > { %3763 = vmatprep.mubr.msk.f32.mxu0 %vm4167_vm3, %v4166_v18 }
 0x522   : > { %v3757_v48 = vpop.f32.mrb[4].mxu0 }
 0x523   : > { %v1954_v38 = vadd.f32 %v3757_v48, %v1952_v16  ;;  %v2006_v28 = vadd.f32 %v3757_v48, %v2004_v29  ;;  %v2054_v50 = vadd.f32 %v3757_v48, %v2052_v17  ;;  %v1930_v62 = vpop.f32.mrb[5].mxu0 }
 0x524   : > { %v1953_v63 = vadd.f32 %v1952_v16, %v1930_v62  ;;  %v2005_v54 = vadd.f32 %v2004_v29, %v1930_v62  ;;  %v2053_v0 = vadd.f32 %v2052_v17, %v1930_v62  ;;  %v3542_v62 = vld [vmem:[%s4897_s2 + $0xa0] ss:$0 sm:$0xff] }
 0x525   : > { %v3539_v3 = vmul.f32 -1.442695, %v1954_v38  ;;  %v3544_v6 = vmul.f32 -1.442695, %v2006_v28  ;;  %v3548_v11 = vmul.f32 -1.442695, %v2054_v50 }
 0x526   : > { %v3538_v24 = vmul.f32 -1.442695, %v1953_v63  ;;  %v3543_v21 = vmul.f32 -1.442695, %v2005_v54  ;;  %v3547_v30 = vmul.f32 -1.442695, %v2053_v0 }
 0x527   : > { %4022 = vpow2.f32 %v3539_v3 }
 0x528   : > { %4024 = vpow2.f32 %v3544_v6 }
 0x529   : > { %4026 = vpow2.f32 %v3548_v11 }
 0x52a   : > { %4028 = vpow2.f32 %v3538_v24  ;;  %v3760_v22 = vpop.f32.mrb[6].mxu0 }
 0x52b   : > { %4030 = vpow2.f32 %v3543_v21  ;;  %v1956_v23 = vadd.f32 %v3760_v22, %v1952_v16  ;;  %v2008_v33 = vadd.f32 %v3760_v22, %v2004_v29  ;;  %v2056_v46 = vadd.f32 %v3760_v22, %v2052_v17  ;;  %v1940_v36 = vpop.f32.mrb[7].mxu0 }
 0x52c   : > { %4032 = vpow2.f32 %v3547_v30  ;;  %v1955_v39 = vadd.f32 %v1952_v16, %v1940_v36  ;;  %v2007_v10 = vadd.f32 %v2004_v29, %v1940_v36  ;;  %v2055_v59 = vadd.f32 %v2052_v17, %v1940_v36 }
 0x52d   : > { %v3541_v40 = vmul.f32 -1.442695, %v1956_v23  ;;  %v3546_v47 = vmul.f32 -1.442695, %v2008_v33  ;;  %v3550_v49 = vmul.f32 -1.442695, %v2056_v46 }
 0x52e   : > { %v3540_v51 = vmul.f32 -1.442695, %v1955_v39  ;;  %v3545_v52 = vmul.f32 -1.442695, %v2007_v10  ;;  %v3549_v16 = vmul.f32 -1.442695, %v2055_v59 }
 0x52f   : > { %4034 = vpow2.f32 %v3541_v40 }
 0x530   : > { %4036 = vpow2.f32 %v3546_v47 }
 0x531   : > { %v4023_v55 = vpop.eup %4022  ;;  %4038 = vpow2.f32 %v3550_v49 }
 0x532   : > { %v4025_v26 = vpop.eup %4024  ;;  %v1970_v57 = vadd.f32 1.0, %v4023_v55  ;;  %4040 = vpow2.f32 %v3540_v51 }
 0x533   : > { %v4027_v44 = vpop.eup %4026  ;;  %v2022_v60 = vadd.f32 1.0, %v4025_v26  ;;  %4042 = vpow2.f32 %v3545_v52 }
 0x534   : > { %v4029_v56 = vpop.eup %4028  ;;  %4044 = vrcp.f32 %v1970_v57  ;;  %v2070_v61 = vadd.f32 1.0, %v4027_v44 }
 0x535   : > { %v4031_v31 = vpop.eup %4030  ;;  %4046 = vrcp.f32 %v2022_v60  ;;  %v1969_v5 = vadd.f32 1.0, %v4029_v56 }
 0x536   : > { %v4033_v9 = vpop.eup %4032  ;;  %4048 = vrcp.f32 %v2070_v61  ;;  %v2021_v13 = vadd.f32 1.0, %v4031_v31 }
 0x537   : > { %4050 = vrcp.f32 %v1969_v5  ;;  %v2069_v29 = vadd.f32 1.0, %v4033_v9 }
 0x538   : > { %4052 = vrcp.f32 %v2021_v13 }
 0x539   : > { %v4035_v48 = vpop.eup %4034  ;;  %4054 = vrcp.f32 %v2069_v29 }
 0x53a   : > { %v4037_v38 = vpop.eup %4036  ;;  %v1972_v17 = vadd.f32 1.0, %v4035_v48  ;;  %4056 = vpow2.f32 %v3549_v16 }
 0x53b   : > { %v4039_v28 = vpop.eup %4038  ;;  %v2024_v46 = vadd.f32 1.0, %v4037_v38 }
 0x53c   : > { %v4041_v50 = vpop.eup %4040  ;;  %4058 = vrcp.f32 %v1972_v17  ;;  %v2072_v21 = vadd.f32 1.0, %v4039_v28 }
 0x53d   : > { %v4043_v63 = vpop.eup %4042  ;;  %v1971_v54 = vadd.f32 1.0, %v4041_v50 }
 0x53e   : > { %v4625_v0 = vpop.eup %4044  ;;  %v2023_v3 = vadd.f32 1.0, %v4043_v63 }
 0x53f   : > { %v4627_v6 = vpop.eup %4046  ;;  %4060 = vrcp.f32 %v1971_v54  ;;  %v1986_v11 = vmul.f32 %v4625_v0, %v3542_v62 }
 0x540   : > { %v4630_v24 = vpop.eup %4048  ;;  %4062 = vrcp.f32 %v2023_v3  ;;  %v2034_v30 = vmul.f32 %v4627_v6, %v3542_v62 }
 0x541   : > { %v4633_v22 = vpop.eup %4050  ;;  %v1992_v23 = vsel %vm286_vm0, %v1986_v11, 0.0  ;;  %4064 = vrcp.f32 %v2072_v21  ;;  %v2082_v52 = vmul.f32 %v4630_v24, %v3542_v62 }
 0x542   : > { %v4053_v33 = vpop.eup %4052  ;;  %v2040_v36 = vsel %vm286_vm0, %v2034_v30, 0.0  ;;  %1993 = vadd.xlane.f32.xlu1 %v1992_v23  ;;  %v1985_v39 = vmul.f32 %v4633_v22, %v3542_v62  ;;  %4066 = vrcp.f32 %v2024_v46 }
 0x543   : > { %v4638_v10 = vpop.eup %4054  ;;  %3762 = vmatpush3.msra.mxu0 %v4053_v33  ;;  %2041 = vadd.xlane.f32.xlu0 %v2040_v36  ;;  %v2033_v40 = vmul.f32 %v4053_v33, %v3542_v62  ;;  %v2088_v44 = vsel %vm286_vm0, %v2082_v52, 0.0 }
 0x544   : > { %v4057_v47 = vpop.eup %4056  ;;  %3766 = vmatprep.subr.mxu0 %v4166_v18  ;;  %v1989_v55 = vsel %vm286_vm0, %v1985_v39, 0.0  ;;  %v2081_v26 = vmul.f32 %v4638_v10, %v3542_v62 }
 0x545   : > { %v2071_v49 = vadd.f32 1.0, %v4057_v47  ;;  %v2037_v51 = vsel %vm286_vm0, %v2033_v40, 0.0 }
 0x546   : > { %2038 = vadd.xlane.f32.xlu1 %v2037_v51  ;;  %v4645_v57 = vpop.eup %4058  ;;  %v2085_v56 = vsel %vm286_vm0, %v2081_v26, 0.0 }
 0x547   : > { %4068 = vrcp.f32 %v2071_v49  ;;  %1990 = vadd.xlane.f32.xlu0 %v1989_v55  ;;  %v1988_v9 = vmul.f32 %v4645_v57, %v3542_v62 }
 0x549   : > { %v4647_v59 = vpop.eup %4060  ;;  %v1998_v38 = vsel %vm286_vm0, %v1988_v9, 0.0 }
 0x54a   : > { %v4650_v60 = vpop.eup %4062  ;;  %2089 = vadd.xlane.f32.xlu1 %v2088_v44  ;;  %v1987_v61 = vmul.f32 %v4647_v59, %v3542_v62 }
 0x54b   : > { %2086 = vadd.xlane.f32.xlu0 %v2085_v56  ;;  %v2035_v31 = vmul.f32 %v4650_v60, %v3542_v62  ;;  %v4657_v13 = vpop.eup %4064 }
 0x54c   : > { %v1995_v16 = vsel %vm286_vm0, %v1987_v61, 0.0  ;;  %v4660_v29 = vpop.eup %4066  ;;  %v2084_v17 = vmul.f32 %v4657_v13, %v3542_v62 }
 0x54d   : > { %v2043_v5 = vsel %vm286_vm0, %v2035_v31, 0.0  ;;  %v2036_v63 = vmul.f32 %v4660_v29, %v3542_v62 }
 0x54e   : > { %2044 = vadd.xlane.f32.xlu1 %v2043_v5  ;;  %v2094_v54 = vsel %vm286_vm0, %v2084_v17, 0.0 }
 0x54f   : > { %1996 = vadd.xlane.f32.xlu0 %v1995_v16  ;;  %v2046_v3 = vsel %vm286_vm0, %v2036_v63, 0.0 }
 0x551   : > { %v4662_v48 = vpop.eup %4068 }
 0x552   : > { %1999 = vadd.xlane.f32.xlu1 %v1998_v38  ;;  %v2083_v28 = vmul.f32 %v4662_v48, %v3542_v62 }
 0x554   : > { %v2091_v50 = vsel %vm286_vm0, %v2083_v28, 0.0 }
 0x555   : > { %2092 = vadd.xlane.f32.xlu0 %v2091_v50 }
 0x556   : > { %2095 = vadd.xlane.f32.xlu1 %v2094_v54 }
 0x559   : > { %2047 = vadd.xlane.f32.xlu0 %v2046_v3 }
 0x5cf   : > { %v1994_v11 = vpop.xlane.xlu1 %1993 }
 0x5d0   : > { %v2042_v21 = vpop.xlane.xlu0 %2041  ;;  %v2108_v30 = vrot.slane %v1994_v11, %v4354_v1 }
 0x5d1   : > { %v2160_v23 = vrot.slane %v2042_v21, %v4354_v1 }
 0x5d2   : > { %v2146_v62 = vmul.f32 %v2108_v30, %v4360_v4 }
 0x5d3   : > { %v2039_v33 = vpop.xlane.xlu1 %2038  ;;  %v2198_v40 = vmul.f32 %v2160_v23, %v4363_v19 }
 0x5d4   : > { %v2156_v46 = vrot.slane %v2039_v33, %v4354_v1  ;;  %v1991_v36 = vpop.xlane.xlu0 %1990 }
 0x5d5   : > { %v2104_v39 = vrot.slane %v1991_v36, %v4354_v1  ;;  %v2202_v44 = vadd.f32 %v2198_v40, %v2146_v62 }
 0x5d6   : > { %v2197_v47 = vmul.f32 %v2156_v46, %v4385_v37 }
 0x5d7   : > { %v2145_v49 = vmul.f32 %v2104_v39, %v4382_v35  ;;  %v2090_v51 = vpop.xlane.xlu1 %2089 }
 0x5d8   : > { %v2216_v52 = vrot.slane %v2090_v51, %v4354_v1  ;;  %v2087_v55 = vpop.xlane.xlu0 %2086 }
 0x5d9   : > { %v2212_v26 = vrot.slane %v2087_v55, %v4354_v1  ;;  %v2201_v61 = vadd.f32 %v2197_v47, %v2145_v49 }
 0x5da   : > { %v2254_v56 = vmul.f32 %v2216_v52, %v4371_v12 }
 0x5db   : > { %v2253_v31 = vmul.f32 %v2212_v26, %v4393_v45  ;;  %v2045_v5 = vpop.xlane.xlu1 %2044 }
 0x5dc   : > { %v1997_v9 = vpop.xlane.xlu0 %1996  ;;  %v2258_v16 = vadd.f32 %v2254_v56, %v2202_v44  ;;  %v2164_v38 = vrot.slane %v2045_v5, %v4354_v1 }
 0x5dd   : > { %v2112_v17 = vrot.slane %v1997_v9, %v4354_v1  ;;  %v2257_v28 = vadd.f32 %v2253_v31, %v2201_v61 }
 0x5de   : > { %v2262_v50 = vsel %vm729_vm7, %v2258_v16, -1e+30  ;;  %v2199_v21 = vmul.f32 %v2164_v38, %v4401_v53  ;;  %vm272_vm7 = vcmp.ge.s32.totalorder %v4282_v20, 4 }
 0x5df   : > { %v2000_v63 = vpop.xlane.xlu1 %1999  ;;  %v2268_v54 = vsel %vm736_vm8, %v2262_v50, -inf  ;;  %v2261_v3 = vsel %vm728_vm12, %v2257_v28, -1e+30  ;;  %v2147_v30 = vmul.f32 %v2112_v17, %v4405_v58 }
 0x5e0   : > { %2269 = vmax.xlane.f32.xlu1 %v2268_v54  ;;  %v2265_v11 = vsel %vm736_vm8, %v2261_v3, -inf  ;;  %v2116_v39 = vrot.slane %v2000_v63, %v4354_v1 }
 0x5e1   : > { %2266 = vmax.xlane.f32.xlu0 %v2265_v11  ;;  %v2203_v36 = vadd.f32 %v2199_v21, %v2147_v30 }
 0x5e2   : > { %v2093_v23 = vpop.xlane.xlu0 %2092  ;;  %v2148_v52 = vmul.f32 %v2116_v39, %v4426_v32 }
 0x5e3   : > { %v2220_v33 = vrot.slane %v2093_v23, %v4354_v1  ;;  %v2096_v46 = vpop.xlane.xlu1 %2095 }
 0x5e4   : > { %v2224_v47 = vrot.slane %v2096_v46, %v4354_v1 }
 0x5e5   : > { %v2255_v62 = vmul.f32 %v2220_v33, %v4414_v7 }
 0x5e6   : > { %v2048_v40 = vpop.xlane.xlu0 %2047  ;;  %v2256_v56 = vmul.f32 %v2224_v47, %v4435_v41 }
 0x5e7   : > { %v2168_v49 = vrot.slane %v2048_v40, %v4354_v1  ;;  %v2259_v51 = vadd.f32 %v2255_v62, %v2203_v36 }
 0x5e9   : > { %v2200_v55 = vmul.f32 %v2168_v49, %v4429_v34  ;;  %v2263_v26 = vsel %vm730_vm1, %v2259_v51, -1e+30 }
 0x5ea   : > { %v2271_v44 = vsel %vm736_vm8, %v2263_v26, -inf }
 0x5eb   : > { %v2204_v61 = vadd.f32 %v2200_v55, %v2148_v52  ;;  %2272 = vmax.xlane.f32.xlu0 %v2271_v44 }
 0x5ed   : > { %v2260_v31 = vadd.f32 %v2256_v56, %v2204_v61  ;;  %v3217_v61 = vmul.f32 0.3, %v4589_v43 }
 0x5ef   : > { %v2264_v5 = vsel %vm731_vm2, %v2260_v31, -1e+30 }
 0x5f0   : > { %v2274_v1 = vsel %vm736_vm8, %v2264_v5, -inf }
 0x5f1   : > { %2275 = vmax.xlane.f32.xlu1 %v2274_v1 }
 0x66d   : > { %v2270_v9 = vpop.xlane.xlu1 %2269 }
 0x66e   : > { %v2278_v16 = vsub.f32 %v2262_v50, %v2270_v9  ;;  %v2267_v38 = vpop.xlane.xlu0 %2266 }
 0x66f   : > { %v2277_v17 = vsub.f32 %v2261_v3, %v2267_v38 }
 0x670   : > { %v2283_v28 = vmul.f32 1.442695, %v2278_v16 }
 0x671   : > { %v2281_v63 = vmul.f32 1.442695, %v2277_v17  ;;  %v3218_v17 = vmul.f32 0.3, %v4586_v25 }
 0x672   : > { %4070 = vpow2.f32 %v2283_v28 }
 0x673   : > { %4072 = vpow2.f32 %v2281_v63 }
 0x678   : > { %v2273_v54 = vpop.xlane.xlu0 %2272 }
 0x679   : > { %v2279_v11 = vsub.f32 %v2263_v26, %v2273_v54 }
 0x67b   : > { %v2285_v21 = vmul.f32 1.442695, %v2279_v11 }
 0x67c   : > { %v4071_v30 = vpop.eup %4070 }
 0x67d   : > { %v4073_v23 = vpop.eup %4072  ;;  %4074 = vpow2.f32 %v2285_v21  ;;  %v4708_v33 = vmul.f32 %v4071_v30, %v4357_v2 }
 0x67e   : > { %v2276_v46 = vpop.xlane.xlu1 %2275  ;;  %v2289_v36 = vmul.f32 %v4073_v23, %v4375_v27  ;;  %v3219_v23 = vmul.f32 0.3, %v4602_v14 }
 0x67f   : > { %v2280_v39 = vsub.f32 %v2264_v5, %v2276_v46  ;;  %v2296_v50 = vsel %vm736_vm8, %v4708_v33, 0.0  ;;  %v2310_v2 = vmul.f32 %v4708_v33, %v4363_v19 }
 0x680   : > { %2297 = vadd.xlane.f32.xlu1 %v2296_v50  ;;  %v2293_v3 = vsel %vm736_vm8, %v2289_v36, 0.0  ;;  %v2309_v62 = vmul.f32 %v2289_v36, %v4385_v37 }
 0x681   : > { %v2287_v40 = vmul.f32 1.442695, %v2280_v39  ;;  %2294 = vadd.xlane.f32.xlu0 %v2293_v3 }
 0x682   : > { %3764 = vmatmul.mubr.msk.f32.vlgmr.msra.gmra.mrb[8].mxu0 %vm736_vm8, %v2309_v62  ;;  %v3220_v62 = vmul.f32 0.3, %v4607_v15 }
 0x683   : > { %4076 = vpow2.f32 %v2287_v40  ;;  %3767 = vmatpush3.msra.mxu0 %v4627_v6  ;;  %3768 = vmatprep.mubr.msk.f32.mxu0 %vm4167_vm3, %v4166_v18 }
 0x684   : > { %3771 = vmatprep.subr.mxu0 %v4166_v18 }
 0x686   : > { %3769 = vmatmul.mubr.msk.f32.vlgmr.msra.gmra.mrb[10].mxu0 %vm736_vm8, %v2310_v2  ;;  %v3563_v2 = vld [vmem:[%s4897_s2 + $0x98] ss:$0 sm:$0xff] }
 0x687   : > { %v4075_v27 = vpop.eup %4074  ;;  %3772 = vmatpush3.msra.mxu0 %v4650_v60  ;;  %3773 = vmatprep.mubr.msk.f32.mxu0 %vm4167_vm3, %v4166_v18 }
 0x688   : > { %3776 = vmatprep.subr.mxu0 %v4166_v18  ;;  %v2291_v37 = vmul.f32 %v4075_v27, %v4390_v42 }
 0x68a   : > { %v2299_v6 = vsel %vm736_vm8, %v2291_v37, 0.0  ;;  %v2311_v47 = vmul.f32 %v2291_v37, %v4401_v53  ;;  %v2305_v53 = vmul.f32 %v2289_v36, %v4382_v35  ;;  %v2307_v35 = vmul.f32 %v2291_v37, %v4405_v58 }
 0x68b   : > { %2300 = vadd.xlane.f32.xlu0 %v2299_v6  ;;  %v2897_v58 = vmul.f32 %v2289_v36, %v4393_v45  ;;  %v2899_v45 = vmul.f32 %v2291_v37, %v4414_v7 }
 0x68c   : > { %3774 = vmatmul.mubr.msk.f32.vlgmr.msra.gmra.mrb[12].mxu0 %vm736_vm8, %v2311_v47 }
 0x68d   : > { %v4077_v19 = vpop.eup %4076  ;;  %3777 = vmatpush3.msra.mxu0 %v4660_v29  ;;  %3778 = vmatprep.mubr.msk.f32.mxu0 %vm4167_vm3, %v4166_v18 }
 0x68e   : > { %v2292_v60 = vmul.f32 %v4077_v19, %v4417_v8  ;;  %3781 = vmatprep.subr.mxu0 %v4166_v18  ;;  %v2306_v8 = vmul.f32 %v4708_v33, %v4360_v4 }
 0x690   : > { %v2302_v49 = vsel %vm736_vm8, %v2292_v60, 0.0  ;;  %v2312_v42 = vmul.f32 %v2292_v60, %v4429_v34  ;;  %v2308_v4 = vmul.f32 %v2292_v60, %v4426_v32  ;;  %v2898_v32 = vmul.f32 %v4708_v33, %v4371_v12  ;;  %v3527_v34 = vld [vmem:[%s4897_s2 + $0x78] sm:$0xff] }
 0x691   : > { %2303 = vadd.xlane.f32.xlu1 %v2302_v49  ;;  %v2900_v12 = vmul.f32 %v2292_v60, %v4435_v41 }
 0x692   : > { %3779 = vmatmul.mubr.msk.f32.vlgmr.msra.gmra.mrb[14].mxu0 %vm736_vm8, %v2312_v42 }
 0x693   : > { %3782 = vmatpush3.msra.mxu0 %v4633_v22  ;;  %3783 = vmatprep.mubr.msk.f32.mxu0 %vm4167_vm3, %v4166_v18 }
 0x694   : > { %3786 = vmatprep.subr.mxu0 %v4166_v18 }
 0x696   : > { %3784 = vmatmul.mubr.msk.f32.vlgmr.msra.gmra.mrb[8].mxu0 %vm736_vm8, %v2305_v53 }
 0x697   : > { %3787 = vmatpush3.msra.mxu0 %v4625_v0  ;;  %3788 = vmatprep.mubr.msk.f32.mxu0 %vm4167_vm3, %v4166_v18  ;;  %v3528_v0 = vld [vmem:[%s4897_s2 + $0x80] sm:$0xff] }
 0x698   : > { %3791 = vmatprep.subr.mxu0 %v4166_v18  ;;  %v3859_v7 = vpack.c.bf16 %v3528_v0, %v3527_v34 }
 0x69a   : > { %3789 = vmatmul.mubr.msk.f32.vlgmr.msra.gmra.mrb[10].mxu0 %vm736_vm8, %v2306_v8  ;;  %3860 = vmatprep.subr.bf16.mxu1 %v3859_v7 }
 0x69b   : > { %3792 = vmatpush3.msra.mxu0 %v4647_v59  ;;  %3793 = vmatprep.mubr.msk.f32.mxu0 %vm4167_vm3, %v4166_v18 }
 0x69c   : > { %3796 = vmatprep.subr.mxu0 %v4166_v18  ;;  %3862 = vmatpush3.bf16.msra.mxu1 %v3859_v7 }
 0x69e   : > { %3794 = vmatmul.mubr.msk.f32.vlgmr.msra.gmra.mrb[12].mxu0 %vm736_vm8, %v2307_v35 }
 0x69f   : > { %3797 = vmatpush3.msra.mxu0 %v4645_v57  ;;  %3798 = vmatprep.mubr.msk.f32.mxu0 %vm4167_vm3, %v4166_v18 }
 0x6a0   : > { %3801 = vmatprep.subr.mxu0 %v4166_v18 }
 0x6a2   : > { %3799 = vmatmul.mubr.msk.f32.vlgmr.msra.gmra.mrb[14].mxu0 %vm736_vm8, %v2308_v4 }
 0x6a3   : > { %3802 = vmatpush3.msra.mxu0 %v4638_v10  ;;  %3803 = vmatprep.mubr.msk.f32.mxu0 %vm4167_vm3, %v4166_v18 }
 0x6a4   : > { %3806 = vmatprep.subr.mxu0 %v4166_v18 }
 0x6a6   : > { %3804 = vmatmul.mubr.msk.f32.vlgmr.msra.gmra.mrb[8].mxu0 %vm736_vm8, %v2897_v58 }
 0x6a7   : > { %3807 = vmatpush3.msra.mxu0 %v4630_v24  ;;  %3808 = vmatprep.mubr.msk.f32.mxu0 %vm4167_vm3, %v4166_v18  ;;  %v3529_v24 = vld [vmem:[%s4897_s2 + $0x88] sm:$0xff] }
 0x6a8   : > { %3811 = vmatprep.subr.mxu0 %v4166_v18 }
 0x6aa   : > { %3809 = vmatmul.mubr.msk.f32.vlgmr.msra.gmra.mrb[10].mxu0 %vm736_vm8, %v2898_v32 }
 0x6ab   : > { %3812 = vmatpush3.msra.mxu0 %v4662_v48  ;;  %3813 = vmatprep.mubr.msk.f32.mxu0 %vm4167_vm3, %v4166_v18 }
 0x6ac   : > { %3816 = vmatprep.subr.mxu0 %v4166_v18 }
 0x6ae   : > { %3814 = vmatmul.mubr.msk.f32.vlgmr.msra.gmra.mrb[12].mxu0 %vm736_vm8, %v2899_v45 }
 0x6af   : > { %3817 = vmatpush3.msra.mxu0 %v4657_v13  ;;  %3818 = vmatprep.mubr.msk.f32.mxu0 %vm4167_vm3, %v4166_v18  ;;  %v3530_v18 = vld [vmem:[%s4897_s2 + $0x90] sm:$0xff] }
 0x6b0   : > { %v3863_v41 = vpack.c.bf16 %v3530_v18, %v3529_v24 }
 0x6b2   : > { %3819 = vmatmul.mubr.msk.f32.vlgmr.msra.gmra.mrb[14].mxu0 %vm736_vm8, %v2900_v12  ;;  %3864 = vmatprep.subr.bf16.mxu1 %v3863_v41 }
 0x6b3   : > { %3866 = vmatpush3.bf16.msra.mxu1 %v3863_v41 }
 0x70d   : > { %v4803_v57 = vpop.xlane.xlu1 %2297 }
 0x70e   : > { %v4800_v22 = vpop.xlane.xlu0 %2294  ;;  %v3198_v59 = vmax.f32 %v4803_v57, 1e-30  ;;  %vm3351_vm8 = vcmp.gt.f32.partialorder %v4803_v57, 0.5 }
 0x70f   : > { %v3197_v10 = vmax.f32 %v4800_v22, 1e-30  ;;  %vm3350_vm12 = vcmp.gt.f32.partialorder %v4800_v22, 0.5  ;;  %vm3357_vm1 = vmand %vm3351_vm8, %vm272_vm7 }
 0x710   : > { %vm3356_vm2 = vmand %vm3350_vm12, %vm272_vm7 }
 0x711   : > { %4078 = vrcp.f32 %v3197_v10 }
 0x712   : > { %4080 = vrcp.f32 %v3198_v59 }
 0x718   : > { %v4806_v13 = vpop.xlane.xlu0 %2300 }
 0x719   : > { %v3199_v29 = vmax.f32 %v4806_v13, 1e-30  ;;  %vm3352_vm4 = vcmp.gt.f32.partialorder %v4806_v13, 0.5 }
 0x71a   : > { %vm3358_vm6 = vmand %vm3352_vm4, %vm272_vm7 }
 0x71b   : > { %4082 = vrcp.f32 %v3199_v29  ;;  %v4079_v52 = vpop.eup %4078 }
 0x71c   : > { %v4081_v31 = vpop.eup %4080 }
 0x71e   : > { %v4809_v48 = vpop.xlane.xlu1 %2303 }
 0x71f   : > { %v3200_v51 = vmax.f32 %v4809_v48, 1e-30  ;;  %vm3353_vm3 = vcmp.gt.f32.partialorder %v4809_v48, 0.5 }
 0x720   : > { %vm3359_vm5 = vmand %vm3353_vm3, %vm272_vm7 }
 0x721   : > { %4084 = vrcp.f32 %v3200_v51 }
 0x725   : > { %v4083_v28 = vpop.eup %4082 }
 0x72b   : > { %v4085_v33 = vpop.eup %4084 }
 0x779   : > { %v2970_v55 = vpop.f32.mrb[8].mxu0 }
 0x77a   : > { %v3209_v26 = vmul.f32 %v4079_v52, %v2970_v55  ;;  %v3805_v44 = vpop.f32.mrb[9].mxu0 }
 0x77c   : > { %v3213_v56 = vmul.f32 0.7, %v3209_v26 }
 0x77d   : > { %v3043_v5 = vpop.f32.mrb[10].mxu0 }
 0x77e   : > { %v3221_v1 = vadd.f32 %v3217_v61, %v3213_v56  ;;  %v3210_v9 = vmul.f32 %v4081_v31, %v3043_v5  ;;  %v3810_v16 = vpop.f32.mrb[11].mxu0 }
 0x780   : > { %v3214_v38 = vmul.f32 0.7, %v3210_v9  ;;  %3829 = vmatprep.mubr.msk.f32.mxu1 %vm286_vm0, %v3221_v1 }
 0x781   : > { %v3116_v63 = vpop.f32.mrb[12].mxu0 }
 0x782   : > { %v3222_v54 = vadd.f32 %v3218_v17, %v3214_v38  ;;  %v3211_v11 = vmul.f32 %v4083_v28, %v3116_v63  ;;  %v3815_v21 = vpop.f32.mrb[13].mxu0 }
 0x784   : > { %v3215_v30 = vmul.f32 0.7, %v3211_v11  ;;  %3830 = vmatmul.mubr.msk.f32.vlgmr.msra.gmra.mrb[12].mxu1 %vm286_vm0, %v3222_v54 }
 0x785   : > { %v3189_v46 = vpop.f32.mrb[14].mxu0 }
 0x786   : > { %v3223_v36 = vadd.f32 %v3219_v23, %v3215_v30  ;;  %v3212_v39 = vmul.f32 %v4085_v33, %v3189_v46  ;;  %v3820_v50 = vpop.f32.mrb[15].mxu0 }
 0x788   : > { %v3216_v3 = vmul.f32 0.7, %v3212_v39  ;;  %3832 = vmatprep.mubr.msk.f32.mxu1 %vm286_vm0, %v3223_v36 }
 0x78a   : > { %v3224_v40 = vadd.f32 %v3220_v62, %v3216_v3 }
 0x78c   : > { %3833 = vmatmul.mubr.msk.f32.gmra.mrb[14].mxu1 %vm286_vm0, %v3224_v40 }
 0x857   : > { %v3831_v27 = vpop.f32.mrb[12].mxu1 }
 0x858   : > { %v3313_v37 = vadd.f32 %v3831_v27, %v3563_v2  ;;  %v3307_v6 = vpop.f32.mrb[13].mxu1 }
 0x859   : > { %v3308_v47 = vadd.f32 %v3563_v2, %v3307_v6 }
 0x85a   : > { %v3569_v19 = vmul.f32 -1.442695, %v3313_v37 }
 0x85b   : > { %v3568_v60 = vmul.f32 -1.442695, %v3308_v47 }
 0x85c   : > { %4086 = vpow2.f32 %v3569_v19 }
 0x85d   : > { %4088 = vpow2.f32 %v3568_v60 }
 0x85f   : > { %v3834_v49 = vpop.f32.mrb[14].mxu1 }
 0x860   : > { %v3323_v42 = vadd.f32 %v3834_v49, %v3563_v2  ;;  %v3317_v53 = vpop.f32.mrb[15].mxu1 }
 0x861   : > { %v3318_v8 = vadd.f32 %v3563_v2, %v3317_v53 }
 0x862   : > { %v3571_v35 = vmul.f32 -1.442695, %v3323_v42 }
 0x863   : > { %v3570_v4 = vmul.f32 -1.442695, %v3318_v8 }
 0x864   : > { %4090 = vpow2.f32 %v3571_v35 }
 0x865   : > { %4092 = vpow2.f32 %v3570_v4 }
 0x866   : > { %v4087_v58 = vpop.eup %4086 }
 0x867   : > { %v4089_v32 = vpop.eup %4088  ;;  %v3339_v45 = vadd.f32 1.0, %v4087_v58 }
 0x868   : > { %v3338_v12 = vadd.f32 1.0, %v4089_v32 }
 0x869   : > { %4094 = vrcp.f32 %v3339_v45 }
 0x86a   : > { %4096 = vrcp.f32 %v3338_v12 }
 0x86e   : > { %v4091_v34 = vpop.eup %4090 }
 0x86f   : > { %v4093_v0 = vpop.eup %4092  ;;  %v3341_v7 = vadd.f32 1.0, %v4091_v34 }
 0x870   : > { %v3340_v24 = vadd.f32 1.0, %v4093_v0 }
 0x871   : > { %4098 = vrcp.f32 %v3341_v7 }
 0x872   : > { %4100 = vrcp.f32 %v3340_v24 }
 0x873   : > { %v4095_v18 = vpop.eup %4094 }
 0x874   : > { %v4097_v41 = vpop.eup %4096  ;;  %v3369_v10 = vsel %vm3357_vm1, %v4095_v18, %v4586_v25 }
 0x875   : > { %v3368_v59 = vsel %vm3356_vm2, %v4097_v41, %v4589_v43  ;;  %3373 = vst.msk [vmem:[%s247_s5 + $0x8] sm:$0xff] %vm286_vm0, %v3369_v10 }
 0x876   : > { %3372 = vst.msk [vmem:[%s247_s5] sm:$0xff] %vm286_vm0, %v3368_v59 }
 0x87b   : > { %v4099_v22 = vpop.eup %4098 }
 0x87c   : > { %v4101_v25 = vpop.eup %4100  ;;  %v3371_v43 = vsel %vm3359_vm5, %v4099_v22, %v4607_v15 }
 0x87d   : > { %v3370_v57 = vsel %vm3358_vm6, %v4101_v25, %v4602_v14  ;;  %3375 = vst.msk [vmem:[%s247_s5 + $0x18] sm:$0xff] %vm286_vm0, %v3371_v43 }
 0x87e   : > { %3374 = vst.msk [vmem:[%s247_s5 + $0x10] sm:$0xff] %vm286_vm0, %v3370_v57 }
 0x87f   : > { %4115 = shalt.err (!%p4112_p7)
}
 0x880   : > { %s4116_s24 = scalar_lea.hbm %s4843_s10, 512  ;;  %s4120_s27 = scalar_lea.hbm %s4898_s3, 1024 }
 0x881   : > { %p4117_p10 = scmp.ne.s32.totalorder %s4843_s10, %s4116_s24  ;;  %p4121_p13 = scmp.lt.u32.totalorder %s4843_s10, %s4898_s3 }
 0x882   : > { %p4122_p0 = scmp.lt.u32.totalorder %s4120_s27, %s4116_s24  ;;  %p4124_p2 = scmp.lt.u32.totalorder %s4116_s24, %s4843_s10 }
 0x883   : > { %p4118_p11 = pnand %p4117_p10, %p4230_p6 }
 0x884   : > { %p4123_p1 = por %p4122_p0, %p4121_p13 }
 0x885   : > { %p4119_p12 = pneg %p4118_p11 }
 0x886   : > { %p4125_p3 = por %p4124_p2, %p4123_p1 }
 0x888   : > { %p4126_p4 = pnand %p4125_p3, %p4119_p12 }
 0x88a   : > { %4129 = shalt.err (!%p4126_p4)
}
 0x88b   : > { %s4169_s4 = smov 128   ;;  %s4170_s5 = smov 8  }
 0x88c   : > { %3899 = dma.vmem_to_hbm [thread:$0]  (%p4230_p6), %s4845_s7, 512, %s4843_s10, %s3377_s16, %s4169_s4, %s4169_s4, %s4170_s5  }
 0x88d PF: > { %s3405_s6 = sand.u32 1, %s4152_s12   ;;  %p3902_p5 = pnand %p3472_p9, %p4234_p8 }
 0x88e   : > { %s3406_s8 = scalar_lea.sflag [#allocation4], %s3405_s6 }
 0x88f   : > { %4147 = dma.done.wait (!%p3902_p5), %s3406_s8, 512  }
 0x890   : > { %4149 = vsyncadd (!%p3902_p5), %s3406_s8, 4294966784  ;;  %p13_p7 = scmp.ge.s32.totalorder %s4216_s18, 4   ;;  %s4901_s12 = smov %s4156_s13 }
 0x891   : > { %s4902_s13 = smov %s4160_s14  ;;  %s4903_s14 = smov %s4228_s21 }
 0x892   : > { %s4904_s15 = smov %s4216_s18  ;;  %15 = sbr.rel (!%p13_p7) target bundleno = 3 (0x3), region = 115 }
 0x899   :  { %3411 = vsyncpa [#allocation4], 1 }
 0x89a   :  { %3413 = vsyncpa [#allocation4 + $0x1], 1 }

</bundles_post_ra>
